<compile_context>
chip_gen: v7x
topology: tpu7x:2x2x1
jax: 0.10.0
libtpu: 0.0.40
codegen_flags: <defaults>
</compile_context>

<pallas_src>
from functools import partial

import jax
import jax.numpy as jnp
from jax import lax
from jax.experimental import pallas as pl
from jax.experimental.pallas import tpu as pltpu

K = 5            # kernel_size
PAD = K // 2     # padding = kernel_size // 2
STRIDE = 1       # this script implements the stride=1 configuration
NEG_SLOPE = 0.2  # LeakyReLU slope
EPS = 1e-5       # BatchNorm eps


def _lrelu(x):
    return jnp.where(x > 0, x, NEG_SLOPE * x)


def _channel_totals(stacked, c):
    """stacked: (k, W*C) lane-dense row sums.  Tree-sums the W lanes of every channel
    (stride-c residue classes) with lane rotations so each lane ends up holding its
    channel total.  Requires W = WC // c to be a power of two (asserted in wrapper)."""
    wc = stacked.shape[-1]
    s = stacked
    shift = c
    while shift < wc:
        s = s + pltpu.roll(s, shift, axis=1)
        shift *= 2
    return s


def residual_block_kernel(C, inv_count,
                          xh_ref, band1_ref, band2_ref, bsk_ref, vecs_ref,
                          out_ref):
    # xh_ref   : (N, H+2P, W*Cin_p) input, lane-dense (Cin zero-padded), H-padded only
    # band1_ref: (K*W*Cin_p, W*C)  conv1 block-banded weights, kh taps stacked on rows
    # band2_ref: (K*W*C,     W*C)  conv2 block-banded weights, kh taps stacked on rows
    # bsk_ref  : (W*Cin_p,   W*C)  block-diagonal 1x1 skip conv
    # vecs_ref : (9, W*C) per-lane-tiled [b1,g1,be1, b2,g2,be2, bsk,gsk,besk]
    # out_ref  : (N*H, W*C) lane-dense output
    N, Hp, WCin = xh_ref.shape
    H = Hp - 2 * PAD
    WC = out_ref.shape[-1]
    rows = N * H

    vecs = vecs_ref[...]
    b1v, g1v, be1v = vecs[0:1], vecs[1:2], vecs[2:3]
    b2v, g2v, be2v = vecs[3:4], vecs[4:5], vecs[5:6]
    bskv, gskv, beskv = vecs[6:7], vecs[7:8], vecs[8:9]

    # ---- conv1: im2col along H (5 lane-aligned 128-wide blocks), one band matmul.
    parts1 = []
    xc = None
    for kh in range(K):
        xs = xh_ref[:, pl.ds(kh, H), :].reshape(rows, WCin)
        if kh == PAD:
            xc = xs                            # centre tap doubles as the skip-path input
        parts1.append(xs)
    lhs1 = jnp.concatenate(parts1, axis=-1)                       # (rows, K*WCin)
    acc1 = jnp.dot(lhs1, band1_ref[...], preferred_element_type=jnp.float32) + b1v

    # ---- BN1: fused sum / sum-of-squares stats, roll-tree channel reduction.
    st1 = jnp.concatenate([jnp.sum(acc1, axis=0, keepdims=True),
                           jnp.sum(acc1 * acc1, axis=0, keepdims=True)], axis=0)
    st1 = _channel_totals(st1, C) * inv_count
    mu1 = st1[0:1]
    var1 = st1[1:2] - mu1 * mu1
    y1 = _lrelu((acc1 - mu1) * (lax.rsqrt(var1 + EPS) * g1v) + be1v)

    # ---- skip path: 1x1 conv on the centre tap (independent of y1; overlaps with BN1/conv2)
    sk = jnp.dot(xc, bsk_ref[...], preferred_element_type=jnp.float32) + bskv

    # ---- conv2: H-shifted operands built in registers (no VMEM scratch), one band matmul.
    y1_img = y1.reshape(N, H, WC)
    parts2 = []
    for kh in range(K):
        d = kh - PAD
        if d == 0:
            parts2.append(y1)
        elif d > 0:
            p = jnp.concatenate(
                [y1_img[:, d:, :], jnp.zeros((N, d, WC), jnp.float32)], axis=1)
            parts2.append(p.reshape(rows, WC))
        else:
            p = jnp.concatenate(
                [jnp.zeros((N, -d, WC), jnp.float32), y1_img[:, :H + d, :]], axis=1)
            parts2.append(p.reshape(rows, WC))
    lhs2 = jnp.concatenate(parts2, axis=-1)                       # (rows, K*WC)
    acc2 = jnp.dot(lhs2, band2_ref[...], preferred_element_type=jnp.float32) + b2v

    # ---- BN2 and skip-BN stats batched into one (4, W*C) reduction.
    st = jnp.concatenate([jnp.sum(acc2, axis=0, keepdims=True),
                          jnp.sum(acc2 * acc2, axis=0, keepdims=True),
                          jnp.sum(sk, axis=0, keepdims=True),
                          jnp.sum(sk * sk, axis=0, keepdims=True)], axis=0)
    st = _channel_totals(st, C) * inv_count
    mu2, ey2, mus, esk2 = st[0:1], st[1:2], st[2:3], st[3:4]
    var2 = ey2 - mu2 * mu2
    varsk = esk2 - mus * mus
    y2 = (acc2 - mu2) * (lax.rsqrt(var2 + EPS) * g2v) + be2v
    skn = (sk - mus) * (lax.rsqrt(varsk + EPS) * gskv) + beskv

    out_ref[...] = _lrelu(y2 + skn).astype(out_ref.dtype)


def _full_spec(shape):
    nd = len(shape)
    return pl.BlockSpec(shape, lambda *_: (0,) * nd)


def _make_band(w_hwio, wdim, pad):
    """Fold the kw taps (and W zero-padding) of a conv into a block-banded matrix.

    w_hwio: (Kh, Kw, Ci, Co).  Returns (Kh, wdim*Ci, wdim*Co) with
    band[kh, w_in*Ci + ci, w_out*Co + co] = w[kh, w_in - w_out + pad, ci, co] (0 if OOB).
    """
    Kh, Kw, Ci, Co = w_hwio.shape
    wi = jnp.arange(wdim)[:, None]
    wo = jnp.arange(wdim)[None, :]
    kw = wi - wo + pad
    valid = (kw >= 0) & (kw < Kw)
    kw_c = jnp.clip(kw, 0, Kw - 1)
    band = w_hwio[:, kw_c]                                   # (Kh, W, W, Ci, Co)
    band = band * valid[None, :, :, None, None].astype(w_hwio.dtype)
    band = jnp.transpose(band, (0, 1, 3, 2, 4)).reshape(Kh, wdim * Ci, wdim * Co)
    return band


def residual_block_forward(x_nchw, raw_params):
    """x_nchw: (N, Cin, H, W) float32. Returns (N, Cout, H, W) float32."""
    (w1, b1, g1, be1, w2, b2, g2, be2, wsk, bsk, gsk, besk) = raw_params
    N, Cin, H, W = x_nchw.shape
    C = w1.shape[0]
    WC = W * C
    count = N * H * W
    assert (W & (W - 1)) == 0, "roll-tree BN reduction assumes W is a power of two"

    # Pad Cin so W*Cin_p is a multiple of 128 lanes (lane-dense conv1/skip loads).
    Cin_p = Cin
    while (W * Cin_p) % 128 != 0:
        Cin_p += 1
    WCin = W * Cin_p

    # NCHW -> lane-dense (N, H, W*Cin_p); pad along H only (W padding lives in the bands).
    x = jnp.transpose(x_nchw, (0, 2, 3, 1)).astype(jnp.float32)          # (N,H,W,Cin)
    x = jnp.pad(x, ((0, 0), (0, 0), (0, 0), (0, Cin_p - Cin)))
    xh = jnp.pad(x.reshape(N, H, WCin), ((0, 0), (PAD, PAD), (0, 0)))

    cpad = ((0, 0), (0, 0), (0, Cin_p - Cin), (0, 0))
    w1h = jnp.pad(jnp.transpose(w1, (2, 3, 1, 0)), cpad)                 # OIHW->HWIO, pad Ci
    w2h = jnp.transpose(w2, (2, 3, 1, 0))
    wskh = jnp.pad(jnp.transpose(wsk, (2, 3, 1, 0)), cpad)               # (1,1,Cin_p,C)

    band1 = _make_band(w1h, W, PAD).reshape(K * WCin, WC)                # (K*W*Cin_p, W*C)
    band2 = _make_band(w2h, W, PAD).reshape(K * WC, WC)                  # (K*W*C,     W*C)
    bandsk = _make_band(wskh, W, 0)[0]                                   # (W*Cin_p,   W*C)

    lane = lambda v: jnp.tile(v.astype(jnp.float32), W).reshape(1, WC)
    vecs = jnp.concatenate([lane(b1), lane(g1), lane(be1),
                            lane(b2), lane(g2), lane(be2),
                            lane(bsk), lane(gsk), lane(besk)], axis=0)   # (9, W*C)

    args = (xh, band1, band2, bandsk, vecs)
    kernel = partial(residual_block_kernel, C, 1.0 / count)

    out_flat = pl.pallas_call(
        kernel,
        out_shape=jax.ShapeDtypeStruct((N * H, WC), jnp.float32),
        grid=(1,),
        in_specs=[_full_spec(a.shape) for a in args],
        out_specs=_full_spec((N * H, WC)),
        compiler_params=pltpu.CompilerParams(dimension_semantics=("arbitrary",)),
    )(*args)

    return jnp.transpose(out_flat.reshape(N, H, W, C), (0, 3, 1, 2))    # -> NCHW


def reference_forward(x, raw_params):
    """Plain-JAX reference with the exact PyTorch forward semantics (NCHW)."""
    (w1, b1, g1, be1, w2, b2, g2, be2, wsk, bsk, gsk, besk) = raw_params

    def conv(z, w, b, pad):
        y = lax.conv_general_dilated(z, w, (STRIDE, STRIDE), [(pad, pad), (pad, pad)],
                                     dimension_numbers=('NCHW', 'OIHW', 'NCHW'))
        return y + b[None, :, None, None]

    def bn(y, g, be):
        mu = jnp.mean(y, axis=(0, 2, 3), keepdims=True)
        var = jnp.mean((y - mu) ** 2, axis=(0, 2, 3), keepdims=True)
        return (y - mu) / jnp.sqrt(var + EPS) * g[None, :, None, None] + be[None, :, None, None]

    lrelu = lambda z: jnp.where(z > 0, z, NEG_SLOPE * z)
    out = lrelu(bn(conv(x, w1, b1, PAD), g1, be1))
    out = bn(conv(out, w2, b2, PAD), g2, be2)
    sk = bn(conv(x, wsk, bsk, 0), gsk, besk)
    return lrelu(out + sk)


def init_raw_params(key, cin, cout):
    ks = jax.random.split(key, 14)
    w1 = jax.random.normal(ks[0], (cout, cin, K, K), jnp.float32) * 0.1
    b1 = jax.random.normal(ks[1], (cout,), jnp.float32) * 0.1
    g1 = 1.0 + 0.1 * jax.random.normal(ks[2], (cout,), jnp.float32)
    be1 = 0.1 * jax.random.normal(ks[3], (cout,), jnp.float32)
    w2 = jax.random.normal(ks[4], (cout, cout, K, K), jnp.float32) * 0.1
    b2 = jax.random.normal(ks[5], (cout,), jnp.float32) * 0.1
    g2 = 1.0 + 0.1 * jax.random.normal(ks[6], (cout,), jnp.float32)
    be2 = 0.1 * jax.random.normal(ks[7], (cout,), jnp.float32)
    wsk = jax.random.normal(ks[8], (cout, cin, 1, 1), jnp.float32) * 0.1
    bsk = jax.random.normal(ks[9], (cout,), jnp.float32) * 0.1
    gsk = 1.0 + 0.1 * jax.random.normal(ks[10], (cout,), jnp.float32)
    besk = 0.1 * jax.random.normal(ks[11], (cout,), jnp.float32)
    return (w1, b1, g1, be1, w2, b2, g2, be2, wsk, bsk, gsk, besk)


if __name__ == "__main__":
    N, Cin, Cout, H, W = 2, 4, 8, 16, 16
    key = jax.random.PRNGKey(0)
    kx, kp = jax.random.split(key)
    x = jax.random.normal(kx, (N, Cin, H, W), jnp.float32)
    raw = init_raw_params(kp, Cin, Cout)

    y = residual_block_forward(x, raw)
    jax.block_until_ready(y)

    y_ref = reference_forward(x, raw)
    err = float(jnp.max(jnp.abs(y - y_ref)))
    assert y.shape == (N, Cout, H, W), y.shape
    assert err < 1e-3, f"max abs error {err}"
    print("KERNEL_OK")
</pallas_src>

<mosaic_0001>
module attributes {stable_mosaic.version = 11 : i64} {
  func.func @residual_block_kernel(%arg0: i32, %arg1: memref<2x20x128xf32, #tpu.memory_space<vmem>>, %arg2: memref<640x128xf32, #tpu.memory_space<vmem>>, %arg3: memref<640x128xf32, #tpu.memory_space<vmem>>, %arg4: memref<128x128xf32, #tpu.memory_space<vmem>>, %arg5: memref<9x128xf32, #tpu.memory_space<vmem>>, %arg6: memref<32x128xf32, #tpu.memory_space<vmem>>) attributes {dimension_semantics = [#tpu.dimension_semantics<arbitrary>], iteration_bounds = array<i64: 1>, scalar_prefetch = 0 : i64, scratch_operands = 0 : i64, tpu.core_type = #tpu.core_type<tc>, window_params = [{pipeline_mode = #tpu.pipeline_mode<synchronous>, transform_indices = @transform_0, window_bounds = array<i64: 2, 20, 128>}, {pipeline_mode = #tpu.pipeline_mode<synchronous>, transform_indices = @transform_1, window_bounds = array<i64: 640, 128>}, {pipeline_mode = #tpu.pipeline_mode<synchronous>, transform_indices = @transform_2, window_bounds = array<i64: 640, 128>}, {pipeline_mode = #tpu.pipeline_mode<synchronous>, transform_indices = @transform_3, window_bounds = array<i64: 128, 128>}, {pipeline_mode = #tpu.pipeline_mode<synchronous>, transform_indices = @transform_4, window_bounds = array<i64: 9, 128>}, {pipeline_mode = #tpu.pipeline_mode<synchronous>, transform_indices = @transform_5, window_bounds = array<i64: 32, 128>}]} {
    %c0 = arith.constant 0 : index
    %c0_0 = arith.constant 0 : index
    %0 = vector.load %arg5[%c0, %c0_0] : memref<9x128xf32, #tpu.memory_space<vmem>>, vector<9x128xf32>
    %1 = vector.extract_strided_slice %0 {offsets = [0, 0], sizes = [1, 128], strides = [1, 1]} : vector<9x128xf32> to vector<1x128xf32>
    %2 = vector.extract_strided_slice %0 {offsets = [1, 0], sizes = [1, 128], strides = [1, 1]} : vector<9x128xf32> to vector<1x128xf32>
    %3 = vector.extract_strided_slice %0 {offsets = [2, 0], sizes = [1, 128], strides = [1, 1]} : vector<9x128xf32> to vector<1x128xf32>
    %4 = vector.extract_strided_slice %0 {offsets = [3, 0], sizes = [1, 128], strides = [1, 1]} : vector<9x128xf32> to vector<1x128xf32>
    %5 = vector.extract_strided_slice %0 {offsets = [4, 0], sizes = [1, 128], strides = [1, 1]} : vector<9x128xf32> to vector<1x128xf32>
    %6 = vector.extract_strided_slice %0 {offsets = [5, 0], sizes = [1, 128], strides = [1, 1]} : vector<9x128xf32> to vector<1x128xf32>
    %7 = vector.extract_strided_slice %0 {offsets = [6, 0], sizes = [1, 128], strides = [1, 1]} : vector<9x128xf32> to vector<1x128xf32>
    %8 = vector.extract_strided_slice %0 {offsets = [7, 0], sizes = [1, 128], strides = [1, 1]} : vector<9x128xf32> to vector<1x128xf32>
    %9 = vector.extract_strided_slice %0 {offsets = [8, 0], sizes = [1, 128], strides = [1, 1]} : vector<9x128xf32> to vector<1x128xf32>
    %c0_1 = arith.constant 0 : index
    %c0_2 = arith.constant 0 : index
    %c0_3 = arith.constant 0 : index
    %10 = vector.load %arg1[%c0_1, %c0_2, %c0_3] : memref<2x20x128xf32, #tpu.memory_space<vmem>>, vector<2x16x128xf32>
    %11 = vector.shape_cast %10 : vector<2x16x128xf32> to vector<32x128xf32>
    %c0_4 = arith.constant 0 : index
    %c1 = arith.constant 1 : index
    %c0_5 = arith.constant 0 : index
    %12 = vector.load %arg1[%c0_4, %c1, %c0_5] : memref<2x20x128xf32, #tpu.memory_space<vmem>>, vector<2x16x128xf32>
    %13 = vector.shape_cast %12 : vector<2x16x128xf32> to vector<32x128xf32>
    %c0_6 = arith.constant 0 : index
    %c2 = arith.constant 2 : index
    %c0_7 = arith.constant 0 : index
    %14 = vector.load %arg1[%c0_6, %c2, %c0_7] : memref<2x20x128xf32, #tpu.memory_space<vmem>>, vector<2x16x128xf32>
    %15 = vector.shape_cast %14 : vector<2x16x128xf32> to vector<32x128xf32>
    %c0_8 = arith.constant 0 : index
    %c3 = arith.constant 3 : index
    %c0_9 = arith.constant 0 : index
    %16 = vector.load %arg1[%c0_8, %c3, %c0_9] : memref<2x20x128xf32, #tpu.memory_space<vmem>>, vector<2x16x128xf32>
    %17 = vector.shape_cast %16 : vector<2x16x128xf32> to vector<32x128xf32>
    %c0_10 = arith.constant 0 : index
    %c4 = arith.constant 4 : index
    %c0_11 = arith.constant 0 : index
    %18 = vector.load %arg1[%c0_10, %c4, %c0_11] : memref<2x20x128xf32, #tpu.memory_space<vmem>>, vector<2x16x128xf32>
    %19 = vector.shape_cast %18 : vector<2x16x128xf32> to vector<32x128xf32>
    %20 = tpu.concatenate %11, %13, %15, %17, %19 in 1 : vector<32x128xf32>, vector<32x128xf32>, vector<32x128xf32>, vector<32x128xf32>, vector<32x128xf32> -> vector<32x640xf32>
    %c0_12 = arith.constant 0 : index
    %c0_13 = arith.constant 0 : index
    %21 = vector.load %arg2[%c0_12, %c0_13] : memref<640x128xf32, #tpu.memory_space<vmem>>, vector<640x128xf32>
    %cst = arith.constant dense<0.000000e+00> : vector<32x128xf32>
    %22 = tpu.matmul %20, %21, %cst {dimension_numbers = #tpu.dot_dimension_numbers<[1], [0], [0], [1], [0, 0, 1, 1], [], []>} : vector<32x640xf32>, vector<640x128xf32>, vector<32x128xf32> -> vector<32x128xf32>
    %23 = vector.broadcast %1 : vector<1x128xf32> to vector<32x128xf32>
    %24 = arith.addf %22, %23 : vector<32x128xf32>
    %cst_14 = arith.constant dense<0.000000e+00> : vector<128xf32>
    %25 = vector.multi_reduction <add>, %24, %cst_14 [0] : vector<32x128xf32> to vector<128xf32>
    %26 = vector.shape_cast %25 : vector<128xf32> to vector<1x128xf32>
    %27 = arith.mulf %24, %24 : vector<32x128xf32>
    %cst_15 = arith.constant dense<0.000000e+00> : vector<128xf32>
    %28 = vector.multi_reduction <add>, %27, %cst_15 [0] : vector<32x128xf32> to vector<128xf32>
    %29 = vector.shape_cast %28 : vector<128xf32> to vector<1x128xf32>
    %30 = tpu.concatenate %26, %29 in 0 : vector<1x128xf32>, vector<1x128xf32> -> vector<2x128xf32>
    %c8_i32 = arith.constant 8 : i32
    %31 = tpu.dynamic_rotate %30 by %c8_i32 dim 1 : vector<2x128xf32>, i32 -> vector<2x128xf32>
    %32 = arith.addf %30, %31 : vector<2x128xf32>
    %c16_i32 = arith.constant 16 : i32
    %33 = tpu.dynamic_rotate %32 by %c16_i32 dim 1 : vector<2x128xf32>, i32 -> vector<2x128xf32>
    %34 = arith.addf %32, %33 : vector<2x128xf32>
    %c32_i32 = arith.constant 32 : i32
    %35 = tpu.dynamic_rotate %34 by %c32_i32 dim 1 : vector<2x128xf32>, i32 -> vector<2x128xf32>
    %36 = arith.addf %34, %35 : vector<2x128xf32>
    %c64_i32 = arith.constant 64 : i32
    %37 = tpu.dynamic_rotate %36 by %c64_i32 dim 1 : vector<2x128xf32>, i32 -> vector<2x128xf32>
    %38 = arith.addf %36, %37 : vector<2x128xf32>
    %cst_16 = arith.constant 0.001953125 : f32
    %39 = vector.broadcast %cst_16 : f32 to vector<2x128xf32>
    %40 = arith.mulf %38, %39 : vector<2x128xf32>
    %41 = vector.extract_strided_slice %40 {offsets = [0, 0], sizes = [1, 128], strides = [1, 1]} : vector<2x128xf32> to vector<1x128xf32>
    %42 = vector.extract_strided_slice %40 {offsets = [1, 0], sizes = [1, 128], strides = [1, 1]} : vector<2x128xf32> to vector<1x128xf32>
    %43 = arith.mulf %41, %41 : vector<1x128xf32>
    %44 = arith.subf %42, %43 : vector<1x128xf32>
    %45 = vector.broadcast %41 : vector<1x128xf32> to vector<32x128xf32>
    %46 = arith.subf %24, %45 : vector<32x128xf32>
    %cst_17 = arith.constant 9.99999974E-6 : f32
    %47 = vector.broadcast %cst_17 : f32 to vector<1x128xf32>
    %48 = arith.addf %44, %47 : vector<1x128xf32>
    %49 = math.rsqrt %48 : vector<1x128xf32>
    %50 = arith.mulf %49, %2 : vector<1x128xf32>
    %51 = vector.broadcast %50 : vector<1x128xf32> to vector<32x128xf32>
    %52 = arith.mulf %46, %51 : vector<32x128xf32>
    %53 = vector.broadcast %3 : vector<1x128xf32> to vector<32x128xf32>
    %54 = arith.addf %52, %53 : vector<32x128xf32>
    %cst_18 = arith.constant 0.000000e+00 : f32
    %55 = vector.broadcast %cst_18 : f32 to vector<32x128xf32>
    %56 = arith.cmpf ogt, %54, %55 : vector<32x128xf32>
    %cst_19 = arith.constant 2.000000e-01 : f32
    %57 = vector.broadcast %cst_19 : f32 to vector<32x128xf32>
    %58 = arith.mulf %57, %54 : vector<32x128xf32>
    %59 = arith.select %56, %54, %58 : vector<32x128xi1>, vector<32x128xf32>
    %c0_20 = arith.constant 0 : index
    %c0_21 = arith.constant 0 : index
    %60 = vector.load %arg4[%c0_20, %c0_21] : memref<128x128xf32, #tpu.memory_space<vmem>>, vector<128x128xf32>
    %cst_22 = arith.constant dense<0.000000e+00> : vector<32x128xf32>
    %61 = tpu.matmul %15, %60, %cst_22 {dimension_numbers = #tpu.dot_dimension_numbers<[1], [0], [0], [1], [0, 0, 1, 1], [], []>} : vector<32x128xf32>, vector<128x128xf32>, vector<32x128xf32> -> vector<32x128xf32>
    %62 = vector.broadcast %7 : vector<1x128xf32> to vector<32x128xf32>
    %63 = arith.addf %61, %62 : vector<32x128xf32>
    %64 = vector.shape_cast %59 : vector<32x128xf32> to vector<2x16x128xf32>
    %cst_23 = arith.constant 0.000000e+00 : f32
    %65 = vector.broadcast %cst_23 : f32 to vector<2x2x128xf32>
    %66 = vector.extract_strided_slice %64 {offsets = [0, 0, 0], sizes = [2, 14, 128], strides = [1, 1, 1]} : vector<2x16x128xf32> to vector<2x14x128xf32>
    %67 = tpu.concatenate %65, %66 in 1 : vector<2x2x128xf32>, vector<2x14x128xf32> -> vector<2x16x128xf32>
    %68 = vector.shape_cast %67 : vector<2x16x128xf32> to vector<32x128xf32>
    %cst_24 = arith.constant 0.000000e+00 : f32
    %69 = vector.broadcast %cst_24 : f32 to vector<2x1x128xf32>
    %70 = vector.extract_strided_slice %64 {offsets = [0, 0, 0], sizes = [2, 15, 128], strides = [1, 1, 1]} : vector<2x16x128xf32> to vector<2x15x128xf32>
    %71 = tpu.concatenate %69, %70 in 1 : vector<2x1x128xf32>, vector<2x15x128xf32> -> vector<2x16x128xf32>
    %72 = vector.shape_cast %71 : vector<2x16x128xf32> to vector<32x128xf32>
    %73 = vector.extract_strided_slice %64 {offsets = [0, 1, 0], sizes = [2, 15, 128], strides = [1, 1, 1]} : vector<2x16x128xf32> to vector<2x15x128xf32>
    %cst_25 = arith.constant 0.000000e+00 : f32
    %74 = vector.broadcast %cst_25 : f32 to vector<2x1x128xf32>
    %75 = tpu.concatenate %73, %74 in 1 : vector<2x15x128xf32>, vector<2x1x128xf32> -> vector<2x16x128xf32>
    %76 = vector.shape_cast %75 : vector<2x16x128xf32> to vector<32x128xf32>
    %77 = vector.extract_strided_slice %64 {offsets = [0, 2, 0], sizes = [2, 14, 128], strides = [1, 1, 1]} : vector<2x16x128xf32> to vector<2x14x128xf32>
    %cst_26 = arith.constant 0.000000e+00 : f32
    %78 = vector.broadcast %cst_26 : f32 to vector<2x2x128xf32>
    %79 = tpu.concatenate %77, %78 in 1 : vector<2x14x128xf32>, vector<2x2x128xf32> -> vector<2x16x128xf32>
    %80 = vector.shape_cast %79 : vector<2x16x128xf32> to vector<32x128xf32>
    %81 = tpu.concatenate %68, %72, %59, %76, %80 in 1 : vector<32x128xf32>, vector<32x128xf32>, vector<32x128xf32>, vector<32x128xf32>, vector<32x128xf32> -> vector<32x640xf32>
    %c0_27 = arith.constant 0 : index
    %c0_28 = arith.constant 0 : index
    %82 = vector.load %arg3[%c0_27, %c0_28] : memref<640x128xf32, #tpu.memory_space<vmem>>, vector<640x128xf32>
    %cst_29 = arith.constant dense<0.000000e+00> : vector<32x128xf32>
    %83 = tpu.matmul %81, %82, %cst_29 {dimension_numbers = #tpu.dot_dimension_numbers<[1], [0], [0], [1], [0, 0, 1, 1], [], []>} : vector<32x640xf32>, vector<640x128xf32>, vector<32x128xf32> -> vector<32x128xf32>
    %84 = vector.broadcast %4 : vector<1x128xf32> to vector<32x128xf32>
    %85 = arith.addf %83, %84 : vector<32x128xf32>
    %cst_30 = arith.constant dense<0.000000e+00> : vector<128xf32>
    %86 = vector.multi_reduction <add>, %85, %cst_30 [0] : vector<32x128xf32> to vector<128xf32>
    %87 = vector.shape_cast %86 : vector<128xf32> to vector<1x128xf32>
    %88 = arith.mulf %85, %85 : vector<32x128xf32>
    %cst_31 = arith.constant dense<0.000000e+00> : vector<128xf32>
    %89 = vector.multi_reduction <add>, %88, %cst_31 [0] : vector<32x128xf32> to vector<128xf32>
    %90 = vector.shape_cast %89 : vector<128xf32> to vector<1x128xf32>
    %cst_32 = arith.constant dense<0.000000e+00> : vector<128xf32>
    %91 = vector.multi_reduction <add>, %63, %cst_32 [0] : vector<32x128xf32> to vector<128xf32>
    %92 = vector.shape_cast %91 : vector<128xf32> to vector<1x128xf32>
    %93 = arith.mulf %63, %63 : vector<32x128xf32>
    %cst_33 = arith.constant dense<0.000000e+00> : vector<128xf32>
    %94 = vector.multi_reduction <add>, %93, %cst_33 [0] : vector<32x128xf32> to vector<128xf32>
    %95 = vector.shape_cast %94 : vector<128xf32> to vector<1x128xf32>
    %96 = tpu.concatenate %87, %90, %92, %95 in 0 : vector<1x128xf32>, vector<1x128xf32>, vector<1x128xf32>, vector<1x128xf32> -> vector<4x128xf32>
    %c8_i32_34 = arith.constant 8 : i32
    %97 = tpu.dynamic_rotate %96 by %c8_i32_34 dim 1 : vector<4x128xf32>, i32 -> vector<4x128xf32>
    %98 = arith.addf %96, %97 : vector<4x128xf32>
    %c16_i32_35 = arith.constant 16 : i32
    %99 = tpu.dynamic_rotate %98 by %c16_i32_35 dim 1 : vector<4x128xf32>, i32 -> vector<4x128xf32>
    %100 = arith.addf %98, %99 : vector<4x128xf32>
    %c32_i32_36 = arith.constant 32 : i32
    %101 = tpu.dynamic_rotate %100 by %c32_i32_36 dim 1 : vector<4x128xf32>, i32 -> vector<4x128xf32>
    %102 = arith.addf %100, %101 : vector<4x128xf32>
    %c64_i32_37 = arith.constant 64 : i32
    %103 = tpu.dynamic_rotate %102 by %c64_i32_37 dim 1 : vector<4x128xf32>, i32 -> vector<4x128xf32>
    %104 = arith.addf %102, %103 : vector<4x128xf32>
    %cst_38 = arith.constant 0.001953125 : f32
    %105 = vector.broadcast %cst_38 : f32 to vector<4x128xf32>
    %106 = arith.mulf %104, %105 : vector<4x128xf32>
    %107 = vector.extract_strided_slice %106 {offsets = [0, 0], sizes = [1, 128], strides = [1, 1]} : vector<4x128xf32> to vector<1x128xf32>
    %108 = vector.extract_strided_slice %106 {offsets = [1, 0], sizes = [1, 128], strides = [1, 1]} : vector<4x128xf32> to vector<1x128xf32>
    %109 = vector.extract_strided_slice %106 {offsets = [2, 0], sizes = [1, 128], strides = [1, 1]} : vector<4x128xf32> to vector<1x128xf32>
    %110 = vector.extract_strided_slice %106 {offsets = [3, 0], sizes = [1, 128], strides = [1, 1]} : vector<4x128xf32> to vector<1x128xf32>
    %111 = arith.mulf %107, %107 : vector<1x128xf32>
    %112 = arith.subf %108, %111 : vector<1x128xf32>
    %113 = arith.mulf %109, %109 : vector<1x128xf32>
    %114 = arith.subf %110, %113 : vector<1x128xf32>
    %115 = vector.broadcast %107 : vector<1x128xf32> to vector<32x128xf32>
    %116 = arith.subf %85, %115 : vector<32x128xf32>
    %cst_39 = arith.constant 9.99999974E-6 : f32
    %117 = vector.broadcast %cst_39 : f32 to vector<1x128xf32>
    %118 = arith.addf %112, %117 : vector<1x128xf32>
    %119 = math.rsqrt %118 : vector<1x128xf32>
    %120 = arith.mulf %119, %5 : vector<1x128xf32>
    %121 = vector.broadcast %120 : vector<1x128xf32> to vector<32x128xf32>
    %122 = arith.mulf %116, %121 : vector<32x128xf32>
    %123 = vector.broadcast %6 : vector<1x128xf32> to vector<32x128xf32>
    %124 = arith.addf %122, %123 : vector<32x128xf32>
    %125 = vector.broadcast %109 : vector<1x128xf32> to vector<32x128xf32>
    %126 = arith.subf %63, %125 : vector<32x128xf32>
    %cst_40 = arith.constant 9.99999974E-6 : f32
    %127 = vector.broadcast %cst_40 : f32 to vector<1x128xf32>
    %128 = arith.addf %114, %127 : vector<1x128xf32>
    %129 = math.rsqrt %128 : vector<1x128xf32>
    %130 = arith.mulf %129, %8 : vector<1x128xf32>
    %131 = vector.broadcast %130 : vector<1x128xf32> to vector<32x128xf32>
    %132 = arith.mulf %126, %131 : vector<32x128xf32>
    %133 = vector.broadcast %9 : vector<1x128xf32> to vector<32x128xf32>
    %134 = arith.addf %132, %133 : vector<32x128xf32>
    %135 = arith.addf %124, %134 : vector<32x128xf32>
    %cst_41 = arith.constant 0.000000e+00 : f32
    %136 = vector.broadcast %cst_41 : f32 to vector<32x128xf32>
    %137 = arith.cmpf ogt, %135, %136 : vector<32x128xf32>
    %cst_42 = arith.constant 2.000000e-01 : f32
    %138 = vector.broadcast %cst_42 : f32 to vector<32x128xf32>
    %139 = arith.mulf %138, %135 : vector<32x128xf32>
    %140 = arith.select %137, %135, %139 : vector<32x128xi1>, vector<32x128xf32>
    %c0_43 = arith.constant 0 : index
    %c0_44 = arith.constant 0 : index
    %141 = vector.load %arg6[%c0_43, %c0_44] : memref<32x128xf32, #tpu.memory_space<vmem>>, vector<32x128xf32>
    tpu.vector_store %arg6[%c0_43, %c0_44], %140 {strides = array<i32>} : memref<32x128xf32, #tpu.memory_space<vmem>>, vector<32x128xf32>,
    return
  }
  func.func @transform_0(%arg0: i32) -> (i32, i32, i32) {
    %c0_i32 = arith.constant 0 : i32
    %c0_i32_0 = arith.constant 0 : i32
    %c0_i32_1 = arith.constant 0 : i32
    %c0_i32_2 = arith.constant 0 : i32
    return %c0_i32, %c0_i32_0, %c0_i32_1 : i32, i32, i32
  }
  func.func @transform_1(%arg0: i32) -> (i32, i32) {
    %c0_i32 = arith.constant 0 : i32
    %c0_i32_0 = arith.constant 0 : i32
    %c0_i32_1 = arith.constant 0 : i32
    return %c0_i32, %c0_i32_0 : i32, i32
  }
  func.func @transform_2(%arg0: i32) -> (i32, i32) {
    %c0_i32 = arith.constant 0 : i32
    %c0_i32_0 = arith.constant 0 : i32
    %c0_i32_1 = arith.constant 0 : i32
    return %c0_i32, %c0_i32_0 : i32, i32
  }
  func.func @transform_3(%arg0: i32) -> (i32, i32) {
    %c0_i32 = arith.constant 0 : i32
    %c0_i32_0 = arith.constant 0 : i32
    %c0_i32_1 = arith.constant 0 : i32
    return %c0_i32, %c0_i32_0 : i32, i32
  }
  func.func @transform_4(%arg0: i32) -> (i32, i32) {
    %c0_i32 = arith.constant 0 : i32
    %c0_i32_0 = arith.constant 0 : i32
    %c0_i32_1 = arith.constant 0 : i32
    return %c0_i32, %c0_i32_0 : i32, i32
  }
  func.func @transform_5(%arg0: i32) -> (i32, i32) {
    %c0_i32 = arith.constant 0 : i32
    %c0_i32_0 = arith.constant 0 : i32
    %c0_i32_1 = arith.constant 0 : i32
    return %c0_i32, %c0_i32_0 : i32, i32
  }
}

</mosaic_0001>

<bundles_post_ra>
// kernel: tpu_custom_call.1
= control target key start
LH: loop header
LB: loop body
LE: loop exit
PB: predicated region body
PF: predicated region fallthrough
CT: control target
= control target key end

     0   :  { %10 = vsyncpa [#allocation3], 0  ;;  %s2254_s0 = inlined_call_operand.vmem [shape: f32[2,20,128], index: 0, kind: input, shape index: {}]   ;;  %s2255_s1 = inlined_call_operand.hbm [shape: f32[640,128], index: 1, kind: input, shape index: {}]   ;;  %s2256_s2 = inlined_call_operand.hbm [shape: f32[640,128], index: 2, kind: input, shape index: {}]   ;;  %s2257_s3 = inlined_call_operand.hbm [shape: f32[128,128], index: 3, kind: input, shape index: {}]   ;;  %s2258_s4 = inlined_call_operand.vmem [shape: f32[9,128], index: 4, kind: input, shape index: {}]   ;;  %s2259_s5 = inlined_call_operand.hbm [shape: f32[32,128], index: 5, kind: output, shape index: {}]  }
   0x1   :  { %11 = vsyncpa [#allocation6], 0 }
   0x2   :  { %12 = vsyncpa [#allocation4], 0  ;;  %s1875_s18 = smov [#allocation5]   ;;  %s1876_s20 = smov [#allocation2]  }
   0x3   :  { %s32_s19 = sshll.u32 %s1875_s18, 4  ;;  %s20_s21 = sshll.u32 %s1876_s20, 4  ;;  %s33_s19 = int_to_ptr.vmem [resolvable:$true] %s32_s19  ;;  %s1914_s21 = int_to_ptr.vmem [resolvable:$true] %s20_s21 }
   0x4   :  { %s1781_s24 = scalar_lea.hbm %s2256_s2, 10240 }
   0x5   :  { %p1782_p0 = scmp.ne.s32.totalorder %s2256_s2, %s1781_s24  ;;  %p1785_p1 = scmp.lt.u32.totalorder %s1781_s24, %s2256_s2 }
   0x7   :  { %p1787_p2 = pnand %p1785_p1, %p1782_p0 }
   0x9   :  { %1790 = shalt.err (!%p1787_p2)
}
   0xa   :  { %s1791_s29 = scalar_lea.vmem %s33_s19, 10240  ;;  %p1796_p4 = scmp.lt.s32.totalorder %s33_s19, %s33_s19 }
   0xb   :  { %p1792_p3 = scmp.ne.s32.totalorder %s33_s19, %s1791_s29  ;;  %p1797_p5 = scmp.lt.s32.totalorder %s1791_s29, %s1791_s29 }
   0xd   :  { %p1798_p6 = por %p1797_p5, %p1796_p4 }
   0xf   :  { %p1799_p7 = pnand %p1798_p6, %p1792_p3 }
  0x11   :  { %1802 = shalt.err (!%p1799_p7)
}
  0x12   :  { %s1877_s30 = smov 128   ;;  %s1878_s6 = smov 8  }
  0x13   :  { %38 = dma.hbm_to_vmem [thread:$0]  %s2256_s2, 10240, %s33_s19, [#allocation6], %s1877_s30, %s1877_s30, %s1878_s6  }
  0x14   :  { %s1803_s11 = scalar_lea.hbm %s2255_s1, 10240 }
  0x15   :  { %p1804_p8 = scmp.ne.s32.totalorder %s2255_s1, %s1803_s11  ;;  %p1807_p9 = scmp.lt.u32.totalorder %s1803_s11, %s2255_s1 }
  0x17   :  { %p1809_p10 = pnand %p1807_p9, %p1804_p8 }
  0x19   :  { %1812 = shalt.err (!%p1809_p10)
}
  0x1a   :  { %s1813_s16 = scalar_lea.vmem %s1914_s21, 10240  ;;  %p1818_p12 = scmp.lt.s32.totalorder %s1914_s21, %s1914_s21 }
  0x1b   :  { %p1814_p11 = scmp.ne.s32.totalorder %s1914_s21, %s1813_s16  ;;  %p1819_p13 = scmp.lt.s32.totalorder %s1813_s16, %s1813_s16 }
  0x1d   :  { %p1820_p0 = por %p1819_p13, %p1818_p12 }
  0x1f   :  { %p1821_p1 = pnand %p1820_p0, %p1814_p11 }
  0x21   :  { %1824 = shalt.err (!%p1821_p1)
}
  0x22   :  { %26 = dma.hbm_to_vmem [thread:$0]  %s2255_s1, 10240, %s1914_s21, [#allocation3], %s1877_s30, %s1877_s30, %s1878_s6  }
  0x23   :  { %s1879_s18 = smov [#allocation7]   ;;  %s1825_s23 = scalar_lea.hbm %s2257_s3, 2048 }
  0x24   :  { %s44_s19 = sshll.u32 %s1879_s18, 4  ;;  %p1826_p2 = scmp.ne.s32.totalorder %s2257_s3, %s1825_s23  ;;  %s45_s19 = int_to_ptr.vmem [resolvable:$true] %s44_s19 }
  0x25   :  { %p1829_p3 = scmp.lt.u32.totalorder %s1825_s23, %s2257_s3 }
  0x27   :  { %p1831_p4 = pnand %p1829_p3, %p1826_p2 }
  0x29   :  { %1834 = shalt.err (!%p1831_p4)
}
  0x2a   :  { %s1835_s28 = scalar_lea.vmem %s45_s19, 2048  ;;  %p1840_p6 = scmp.lt.s32.totalorder %s45_s19, %s45_s19 }
  0x2b   :  { %p1836_p5 = scmp.ne.s32.totalorder %s45_s19, %s1835_s28  ;;  %p1841_p7 = scmp.lt.s32.totalorder %s1835_s28, %s1835_s28 }
  0x2d   :  { %p1842_p8 = por %p1841_p7, %p1840_p6 }
  0x2f   :  { %p1843_p9 = pnand %p1842_p8, %p1836_p5 }
  0x31   :  { %1846 = shalt.err (!%p1843_p9)
}
  0x32   :  { %50 = dma.hbm_to_vmem [thread:$0]  %s2257_s3, 2048, %s45_s19, [#allocation6], %s1877_s30, %s1877_s30, %s1878_s6  }
  0x33   :  { %1869 = dma.done.wait [#allocation3], 10240  }
  0x34   :  { %1870 = vsyncadd [#allocation3], 4294957056 }
  0x35   :  { %1871 = dma.done.wait [#allocation6], 12288  }
  0x36   :  { %1872 = vsyncadd [#allocation6], 4294955008  ;;  %v100_v0 = vld [vmem:[#allocation2 + $0x80] sm:$0xff]  ;;  %v101_v1 = vld [vmem:[#allocation2 + $0x88] sm:$0xff]  ;;  %vm445_vm0 = vcmask 1040384   ;;  %s1881_s20 = smov 32  }
  0x37   :  { %v84_v2 = vld [vmem:[#allocation2] sm:$0xff]  ;;  %v1527_v3 = vpack.c.bf16 %v101_v1, %v100_v0  ;;  %v85_v4 = vld [vmem:[#allocation2 + $0x8] sm:$0xff]  ;;  %v102_v11 = vld [vmem:[#allocation2 + $0x90] sm:$0xff]  ;;  %s1882_s22 = smov 64   ;;  %vm613_vm1 = vcmask 1041408   ;;  %vm638_vm2 = vcmask 1046528  }
  0x38   :  { %v132_v5 = vld [vmem:[#allocation2 + $0x180] sm:$0xff]  ;;  %v133_v6 = vld [vmem:[#allocation2 + $0x188] sm:$0xff]  ;;  %v1529_v7 = vpack.c.bf16 %v85_v4, %v84_v2  ;;  %v103_v13 = vld [vmem:[#allocation2 + $0x98] sm:$0xff]  ;;  %vm651_vm9 = vcmask 1045504   ;;  %vm1049_vm10 = vcmask 1042432  }
  0x39   :  { %v1559_v8 = vpack.c.bf16 %v133_v6, %v132_v5  ;;  %v116_v9 = vld [vmem:[#allocation2 + $0x100] sm:$0xff]  ;;  %v117_v10 = vld [vmem:[#allocation2 + $0x108] sm:$0xff]  ;;  %1528 = vmatprep.subr.bf16.mxu0 %v1527_v3  ;;  %v86_v14 = vld [vmem:[#allocation2 + $0x10] sm:$0xff]  ;;  %v1531_v16 = vpack.c.bf16 %v103_v13, %v102_v11 }
  0x3a   :  { %v1561_v12 = vpack.c.bf16 %v117_v10, %v116_v9  ;;  %v87_v15 = vld [vmem:[#allocation2 + $0x18] sm:$0xff]  ;;  %1530 = vmatpush3.bf16.msra.mxu0 %v1529_v7  ;;  %v134_v18 = vld [vmem:[#allocation2 + $0x190] sm:$0xff]  ;;  %v104_v23 = vld [vmem:[#allocation2 + $0xa0] sm:$0xff] }
  0x3b   :  { %1560 = vmatprep.subr.bf16.mxu1 %v1559_v8  ;;  %v1533_v17 = vpack.c.bf16 %v87_v15, %v86_v14  ;;  %v135_v19 = vld [vmem:[#allocation2 + $0x198] sm:$0xff]  ;;  %v118_v20 = vld [vmem:[#allocation2 + $0x110] sm:$0xff]  ;;  %v105_v24 = vld [vmem:[#allocation2 + $0xa8] sm:$0xff]  ;;  %1532 = vmatprep.subr.bf16.mxu0 %v1531_v16 }
  0x3c   :  { %1562 = vmatpush3.bf16.msra.mxu1 %v1561_v12  ;;  %v1563_v21 = vpack.c.bf16 %v135_v19, %v134_v18  ;;  %v119_v22 = vld [vmem:[#allocation2 + $0x118] sm:$0xff]  ;;  %v1535_v26 = vpack.c.bf16 %v105_v24, %v104_v23  ;;  %v88_v27 = vld [vmem:[#allocation2 + $0x20] sm:$0xff]  ;;  %v89_v28 = vld [vmem:[#allocation2 + $0x28] sm:$0xff] }
  0x3d   :  { %v1565_v25 = vpack.c.bf16 %v119_v22, %v118_v20  ;;  %v136_v29 = vld [vmem:[#allocation2 + $0x1a0] sm:$0xff]  ;;  %v137_v30 = vld [vmem:[#allocation2 + $0x1a8] sm:$0xff]  ;;  %v1537_v33 = vpack.c.bf16 %v89_v28, %v88_v27  ;;  %v106_v35 = vld [vmem:[#allocation2 + $0xb0] sm:$0xff] }
  0x3e   :  { %1564 = vmatprep.subr.bf16.mxu1 %v1563_v21  ;;  %v120_v31 = vld [vmem:[#allocation2 + $0x120] sm:$0xff]  ;;  %v121_v32 = vld [vmem:[#allocation2 + $0x128] sm:$0xff]  ;;  %1534 = vmatpush3.bf16.msra.mxu0 %v1533_v17  ;;  %v1567_v34 = vpack.c.bf16 %v137_v30, %v136_v29  ;;  %v107_v36 = vld [vmem:[#allocation2 + $0xb8] sm:$0xff] }
  0x3f   :  { %v90_v37 = vld [vmem:[#allocation2 + $0x30] sm:$0xff]  ;;  %1536 = vmatprep.subr.bf16.mxu0 %v1535_v26  ;;  %v1569_v38 = vpack.c.bf16 %v121_v32, %v120_v31  ;;  %v1539_v39 = vpack.c.bf16 %v107_v36, %v106_v35  ;;  %v91_v40 = vld [vmem:[#allocation2 + $0x38] sm:$0xff]  ;;  %v108_v46 = vld [vmem:[#allocation2 + $0xc0] sm:$0xff] }
  0x40   :  { %1566 = vmatpush3.bf16.msra.mxu1 %v1565_v25  ;;  %v138_v41 = vld [vmem:[#allocation2 + $0x1b0] sm:$0xff]  ;;  %v139_v42 = vld [vmem:[#allocation2 + $0x1b8] sm:$0xff]  ;;  %v109_v47 = vld [vmem:[#allocation2 + $0xc8] sm:$0xff]  ;;  %v1541_v48 = vpack.c.bf16 %v91_v40, %v90_v37 }
  0x41   :  { %1568 = vmatprep.subr.bf16.mxu1 %v1567_v34  ;;  %v1571_v43 = vpack.c.bf16 %v139_v42, %v138_v41  ;;  %v122_v44 = vld [vmem:[#allocation2 + $0x130] sm:$0xff]  ;;  %v123_v45 = vld [vmem:[#allocation2 + $0x138] sm:$0xff]  ;;  %v140_v49 = vld [vmem:[#allocation2 + $0x1c0] sm:$0xff]  ;;  %v1543_v52 = vpack.c.bf16 %v109_v47, %v108_v46 }
  0x42   :  { %1538 = vmatpush3.bf16.msra.mxu0 %v1537_v33  ;;  %v141_v50 = vld [vmem:[#allocation2 + $0x1c8] sm:$0xff]  ;;  %v1573_v51 = vpack.c.bf16 %v123_v45, %v122_v44  ;;  %v92_v53 = vld [vmem:[#allocation2 + $0x40] sm:$0xff]  ;;  %v110_v58 = vld [vmem:[#allocation2 + $0xd0] sm:$0xff] }
  0x43   :  { %1540 = vmatprep.subr.bf16.mxu0 %v1539_v39  ;;  %v93_v54 = vld [vmem:[#allocation2 + $0x48] sm:$0xff]  ;;  %v124_v55 = vld [vmem:[#allocation2 + $0x140] sm:$0xff]  ;;  %v1575_v56 = vpack.c.bf16 %v141_v50, %v140_v49  ;;  %v111_v59 = vld [vmem:[#allocation2 + $0xd8] sm:$0xff] }
  0x44   :  { %1570 = vmatpush3.bf16.msra.mxu1 %v1569_v38  ;;  %v125_v57 = vld [vmem:[#allocation2 + $0x148] sm:$0xff]  ;;  %v142_v60 = vld [vmem:[#allocation2 + $0x1d0] sm:$0xff]  ;;  %v143_v61 = vld [vmem:[#allocation2 + $0x1d8] sm:$0xff]  ;;  %v1545_v62 = vpack.c.bf16 %v93_v54, %v92_v53  ;;  %v1547_v0 = vpack.c.bf16 %v111_v59, %v110_v58 }
  0x45   :  { %1572 = vmatprep.subr.bf16.mxu1 %v1571_v43  ;;  %v1577_v63 = vpack.c.bf16 %v125_v57, %v124_v55  ;;  %v94_v1 = vld [vmem:[#allocation2 + $0x50] sm:$0xff]  ;;  %v95_v2 = vld [vmem:[#allocation2 + $0x58] sm:$0xff]  ;;  %v1579_v4 = vpack.c.bf16 %v143_v61, %v142_v60  ;;  %v112_v6 = vld [vmem:[#allocation2 + $0xe0] sm:$0xff] }
  0x46   :  { %1542 = vmatpush3.bf16.msra.mxu0 %v1541_v48  ;;  %v126_v3 = vld [vmem:[#allocation2 + $0x150] sm:$0xff]  ;;  %v127_v5 = vld [vmem:[#allocation2 + $0x158] sm:$0xff]  ;;  %v113_v7 = vld [vmem:[#allocation2 + $0xe8] sm:$0xff]  ;;  %v1549_v10 = vpack.c.bf16 %v95_v2, %v94_v1 }
  0x47   :  { %1544 = vmatprep.subr.bf16.mxu0 %v1543_v52  ;;  %v144_v8 = vld [vmem:[#allocation2 + $0x1e0] sm:$0xff]  ;;  %v145_v9 = vld [vmem:[#allocation2 + $0x1e8] sm:$0xff]  ;;  %v1581_v13 = vpack.c.bf16 %v127_v5, %v126_v3  ;;  %v1551_v14 = vpack.c.bf16 %v113_v7, %v112_v6  ;;  %v114_v19 = vld [vmem:[#allocation2 + $0xf0] sm:$0xff] }
  0x48   :  { %1574 = vmatpush3.bf16.msra.mxu1 %v1573_v51  ;;  %v96_v11 = vld [vmem:[#allocation2 + $0x60] sm:$0xff]  ;;  %v97_v15 = vld [vmem:[#allocation2 + $0x68] sm:$0xff]  ;;  %v1583_v18 = vpack.c.bf16 %v145_v9, %v144_v8  ;;  %v115_v20 = vld [vmem:[#allocation2 + $0xf8] sm:$0xff] }
  0x49   :  { %1576 = vmatprep.subr.bf16.mxu1 %v1575_v56  ;;  %v68_v12 = vld [vmem:[%s2254_s0 + $0x1] sm:$0xff]  ;;  %v146_v22 = vld [vmem:[#allocation2 + $0x1f0] sm:$0xff]  ;;  %v147_v23 = vld [vmem:[#allocation2 + $0x1f8] sm:$0xff]  ;;  %v1553_v24 = vpack.c.bf16 %v97_v15, %v96_v11  ;;  %v1555_v26 = vpack.c.bf16 %v115_v20, %v114_v19 }
  0x4a   :  { %1546 = vmatpush3.bf16.msra.mxu0 %v1545_v62  ;;  %v128_v16 = vld [vmem:[#allocation2 + $0x160] sm:$0xff]  ;;  %v129_v17 = vld [vmem:[#allocation2 + $0x168] sm:$0xff]  ;;  %232 = vmatprep.mubr.f32.mxu0 %v68_v12  ;;  %v98_v27 = vld [vmem:[#allocation2 + $0x70] sm:$0xff]  ;;  %v1587_v30 = vpack.c.bf16 %v147_v23, %v146_v22  ;;  %v164_v12 = vlaneseq }
  0x4b   :  { %1548 = vmatprep.subr.bf16.mxu0 %v1547_v0  ;;  %v76_v21 = vld [vmem:[%s2254_s0 + $0x3] sm:$0xff]  ;;  %v1585_v25 = vpack.c.bf16 %v129_v17, %v128_v16  ;;  %v99_v28 = vld [vmem:[#allocation2 + $0x78] sm:$0xff]  ;;  %v130_v29 = vld [vmem:[#allocation2 + $0x170] sm:$0xff] }
  0x4c   :  { %1578 = vmatpush3.bf16.msra.mxu1 %v1577_v63  ;;  %317 = vmatprep.mubr.f32.mxu1 %v76_v21  ;;  %v131_v31 = vld [vmem:[#allocation2 + $0x178] sm:$0xff]  ;;  %v148_v32 = vld [vmem:[#allocation2 + $0x200] sm:$0xff]  ;;  %v149_v33 = vld [vmem:[#allocation2 + $0x208] sm:$0xff]  ;;  %v1557_v34 = vpack.c.bf16 %v99_v28, %v98_v27 }
  0x4d   :  { %1580 = vmatprep.subr.bf16.mxu1 %v1579_v4  ;;  %v1589_v35 = vpack.c.bf16 %v131_v31, %v130_v29  ;;  %v1591_v36 = vpack.c.bf16 %v149_v33, %v148_v32  ;;  %v150_v37 = vld [vmem:[#allocation2 + $0x210] sm:$0xff]  ;;  %v151_v38 = vld [vmem:[#allocation2 + $0x218] sm:$0xff]  ;;  %v64_v39 = vld [vmem:[%s2254_s0] sm:$0xff] }
  0x4e   :  { %1550 = vmatpush3.bf16.msra.mxu0 %v1549_v10  ;;  %v72_v40 = vld [vmem:[%s2254_s0 + $0x2] sm:$0xff]  ;;  %v1595_v41 = vpack.c.bf16 %v151_v38, %v150_v37  ;;  %v77_v45 = vld [vmem:[%s2254_s0 + $0xb] sm:$0xff]  ;;  %v155_v50 = vld [vmem:[#allocation2 + $0x238] sm:$0xff] }
  0x4f   :  { %1552 = vmatprep.subr.bf16.mxu0 %v1551_v14  ;;  %v152_v42 = vld [vmem:[#allocation2 + $0x220] sm:$0xff]  ;;  %v153_v43 = vld [vmem:[#allocation2 + $0x228] sm:$0xff]  ;;  %v154_v49 = vld [vmem:[#allocation2 + $0x230] sm:$0xff] }
  0x50   :  { %1582 = vmatpush3.bf16.msra.mxu1 %v1581_v13  ;;  %v69_v44 = vld [vmem:[%s2254_s0 + $0x9] sm:$0xff]  ;;  %v1599_v47 = vpack.c.bf16 %v153_v43, %v152_v42  ;;  %v70_v51 = vld [vmem:[%s2254_s0 + $0x19] sm:$0xff]  ;;  %v1603_v54 = vpack.c.bf16 %v155_v50, %v154_v49  ;;  %v71_v58 = vld [vmem:[%s2254_s0 + $0x21] sm:$0xff]  ;;  %v2035_v13 = vshrl.u32 %v164_v12, 7 }
  0x51   :  { %1584 = vmatprep.subr.bf16.mxu1 %v1583_v18  ;;  %v65_v46 = vld [vmem:[%s2254_s0 + $0x8] sm:$0xff]  ;;  %v78_v52 = vld [vmem:[%s2254_s0 + $0x1b] sm:$0xff]  ;;  %v158_v63 = vld [vmem:[#allocation2 + $0x250] sm:$0xff] }
  0x52   :  { %1554 = vmatpush3.bf16.msra.mxu0 %v1553_v24  ;;  %v1990_v48 = vld [vmem:[%s2254_s0 + $0xa] sm:$0xff]  ;;  %v66_v53 = vld [vmem:[%s2254_s0 + $0x18] sm:$0xff]  ;;  %v156_v56 = vld [vmem:[#allocation2 + $0x240] sm:$0xff]  ;;  %v2038_v14 = vsub.s32 0, %v2035_v13 }
  0x53   :  { %1556 = vmatprep.subr.bf16.mxu0 %v1555_v26  ;;  %v2005_v55 = vld [vmem:[%s2254_s0 + $0x1a] sm:$0xff]  ;;  %v157_v57 = vld [vmem:[#allocation2 + $0x248] sm:$0xff]  ;;  %v162_v6 = vld [vmem:[#allocation2 + $0x270] sm:$0xff] }
  0x54   :  { %1586 = vmatpush3.bf16.msra.mxu1 %v1585_v25  ;;  %v79_v59 = vld [vmem:[%s2254_s0 + $0x23] sm:$0xff]  ;;  %v1607_v61 = vpack.c.bf16 %v157_v57, %v156_v56  ;;  %v159_v0 = vld [vmem:[#allocation2 + $0x258] sm:$0xff]  ;;  %v81_v9 = vld [vmem:[%s2254_s0 + $0xc] sm:$0xff] }
  0x55   :  { %1588 = vmatprep.subr.bf16.mxu1 %v1587_v30  ;;  %v67_v60 = vld [vmem:[%s2254_s0 + $0x20] sm:$0xff]  ;;  %v1611_v2 = vpack.c.bf16 %v159_v0, %v158_v63  ;;  %v161_v4 = vld [vmem:[#allocation2 + $0x268] sm:$0xff]  ;;  %v163_v7 = vld [vmem:[#allocation2 + $0x278] sm:$0xff] }
  0x56   :  { %1558 = vmatpush3.bf16.msra.mxu0 %v1557_v34  ;;  %v2020_v62 = vld [vmem:[%s2254_s0 + $0x22] sm:$0xff]  ;;  %v1619_v8 = vpack.c.bf16 %v163_v7, %v162_v6  ;;  %vm2111_vm5 = vmneg %vm445_vm0 }
  0x57   :  { %1592 = vmatprep.subr.bf16.mxu0 %v1591_v36  ;;  %v80_v1 = vld [vmem:[%s2254_s0 + $0x4] sm:$0xff]  ;;  %v82_v10 = vld [vmem:[%s2254_s0 + $0x1c] sm:$0xff]  ;;  %vm2120_vm8 = vmneg %vm613_vm1 }
  0x58   :  { %1590 = vmatpush3.bf16.msra.mxu1 %v1589_v35  ;;  %v160_v3 = vld [vmem:[#allocation2 + $0x260] sm:$0xff] }
  0x59   :  { %233 = vmatmul.mubr.f32.vlgmr.msra.gmra.mrb[0].mxu0 %v64_v39  ;;  %v1615_v5 = vpack.c.bf16 %v161_v4, %v160_v3  ;;  %v83_v11 = vld [vmem:[%s2254_s0 + $0x24] sm:$0xff]  ;;  %s1880_s0 = smov 16  }
  0x5a   :  { %1594 = vmatpush3.bf16.msra.mxu0 %v1591_v36  ;;  %237 = vmatprep.mubr.f32.mxu0 %v69_v44  ;;  %v2043_v15 = vld [vmem:[%s2258_s4] sm:$0xff] }
  0x5b   :  { %318 = vmatmul.mubr.f32.vlgmr.msra.gmra.mrb[0].mxu1 %v72_v40  ;;  %1596 = vmatprep.subr.bf16.mxu0 %v1595_v41  ;;  %v167_v17 = vrot.slane %v2043_v15, %v2038_v14 }
  0x5c   :  { %322 = vmatprep.mubr.f32.mxu1 %v77_v45 }
  0x5d   :  { %238 = vmatmul.mubr.f32.gmra.mrb[2].mxu0 %v65_v46 }
  0x5e   :  { %1598 = vmatpush3.bf16.msra.mxu0 %v1595_v41  ;;  %242 = vmatprep.mubr.f32.mxu0 %v70_v51 }
  0x5f   :  { %323 = vmatmul.mubr.f32.gmra.mrb[2].mxu1 %v1990_v48  ;;  %1600 = vmatprep.subr.bf16.mxu0 %v1599_v47 }
  0x60   :  { %327 = vmatprep.mubr.f32.mxu1 %v78_v52 }
  0x61   :  { %243 = vmatmul.mubr.f32.gmra.mrb[4].mxu0 %v66_v53 }
  0x62   :  { %1602 = vmatpush3.bf16.msra.mxu0 %v1599_v47  ;;  %247 = vmatprep.mubr.f32.mxu0 %v71_v58 }
  0x63   :  { %328 = vmatmul.mubr.f32.gmra.mrb[4].mxu1 %v2005_v55  ;;  %1604 = vmatprep.subr.bf16.mxu0 %v1603_v54 }
  0x64   :  { %332 = vmatprep.mubr.f32.mxu1 %v79_v59 }
  0x65   :  { %248 = vmatmul.mubr.f32.gmra.mrb[6].mxu0 %v67_v60 }
  0x66   :  { %1606 = vmatpush3.bf16.msra.mxu0 %v1603_v54  ;;  %1445 = vmatprep.mubr.f32.mxu0 %v80_v1 }
  0x67   :  { %333 = vmatmul.mubr.f32.gmra.mrb[6].mxu1 %v2020_v62  ;;  %1608 = vmatprep.subr.bf16.mxu0 %v1607_v61 }
  0x68   :  { %1483 = vmatprep.mubr.f32.mxu1 %v72_v40 }
  0x6a   :  { %1610 = vmatpush3.bf16.msra.mxu0 %v1607_v61 }
  0x6b   :  { %1612 = vmatprep.subr.bf16.mxu0 %v1611_v2 }
  0x6e   :  { %1614 = vmatpush3.bf16.msra.mxu0 %v1611_v2 }
  0x6f   :  { %1616 = vmatprep.subr.bf16.mxu0 %v1615_v5 }
  0x72   :  { %1618 = vmatpush3.bf16.msra.mxu0 %v1615_v5 }
  0x73   :  { %1620 = vmatprep.subr.bf16.mxu0 %v1619_v8 }
  0x76   :  { %1622 = vmatpush3.bf16.msra.mxu0 %v1619_v8 }
  0x79   :  { %1446 = vmatmul.mubr.f32.vlgmr.msra.gmra.mrb[8].mxu0 %v81_v9 }
  0x7a   :  { %1448 = vmatprep.mubr.f32.mxu0 %v82_v10 }
  0x7d   :  { %1449 = vmatmul.mubr.f32.gmra.mrb[10].mxu0 %v83_v11 }
 0x12c   :  { %v1209_v16 = vpop.f32.mrb[0].mxu0 }
 0x12d   :  { %v1210_v18 = vpop.f32.mrb[1].mxu0 }
 0x12e   :  { %v1253_v19 = vpop.f32.mrb[0].mxu1  ;;  %v1211_v20 = vadd.f32 %v1210_v18, %v1209_v16 }
 0x12f   :  { %v1254_v21 = vpop.f32.mrb[1].mxu1 }
 0x130   :  { %v1255_v22 = vadd.f32 %v1254_v21, %v1253_v19  ;;  %v235_v23 = vadd.f32 %v1211_v20, %v167_v17  ;;  %v1212_v24 = vpop.f32.mrb[2].mxu0 }
 0x131   :  { %v1213_v25 = vpop.f32.mrb[3].mxu0 }
 0x132   :  { %v1256_v26 = vpop.f32.mrb[2].mxu1  ;;  %v1214_v27 = vadd.f32 %v1213_v25, %v1212_v24  ;;  %v320_v29 = vadd.f32 %v1255_v22, %v235_v23  ;;  %v504_v24 = vld [vmem:[#allocation7] sm:$0xff]  ;;  %v505_v25 = vld [vmem:[#allocation7 + $0x8] sm:$0xff] }
 0x133   :  { %v1257_v28 = vpop.f32.mrb[3].mxu1 }
 0x134   :  { %v1258_v30 = vadd.f32 %v1257_v28, %v1256_v26  ;;  %v240_v31 = vadd.f32 %v1214_v27, %v167_v17  ;;  %v1215_v32 = vpop.f32.mrb[4].mxu0  ;;  %v506_v26 = vld [vmem:[#allocation7 + $0x10] sm:$0xff]  ;;  %v1623_v27 = vpack.c.bf16 %v505_v25, %v504_v24  ;;  %v507_v28 = vld [vmem:[#allocation7 + $0x18] sm:$0xff]  ;;  %v716_v24 = vld [vmem:[#allocation5 + $0x1a0] sm:$0xff] }
 0x135   :  { %v1216_v33 = vpop.f32.mrb[5].mxu0 }
 0x136   :  { %v1259_v34 = vpop.f32.mrb[4].mxu1  ;;  %v1217_v35 = vadd.f32 %v1216_v33, %v1215_v32  ;;  %v325_v37 = vadd.f32 %v1258_v30, %v240_v31  ;;  %v508_v30 = vld [vmem:[#allocation7 + $0x20] sm:$0xff]  ;;  %v509_v31 = vld [vmem:[#allocation7 + $0x28] sm:$0xff]  ;;  %1624 = vmatprep.subr.bf16.mxu1 %v1623_v27  ;;  %v510_v33 = vld [vmem:[#allocation7 + $0x30] sm:$0xff] }
 0x137   :  { %v1260_v36 = vpop.f32.mrb[5].mxu1  ;;  %1626 = vmatpush3.bf16.msra.mxu1 %v1623_v27  ;;  %v1631_v32 = vpack.c.bf16 %v509_v31, %v508_v30  ;;  %v700_v27 = vld [vmem:[#allocation5 + $0x120] sm:$0xff]  ;;  %v686_v31 = vld [vmem:[#allocation5 + $0xb0] sm:$0xff] }
 0x138   :  { %v1261_v38 = vadd.f32 %v1260_v36, %v1259_v34  ;;  %v245_v39 = vadd.f32 %v1217_v35, %v167_v17  ;;  %v1218_v40 = vpop.f32.mrb[6].mxu0  ;;  %v511_v34 = vld [vmem:[#allocation7 + $0x38] sm:$0xff] }
 0x139   :  { %v1219_v41 = vpop.f32.mrb[7].mxu0 }
 0x13a   :  { %v1262_v42 = vpop.f32.mrb[6].mxu1  ;;  %v1220_v43 = vadd.f32 %v1219_v41, %v1218_v40  ;;  %v330_v45 = vadd.f32 %v1261_v38, %v245_v39  ;;  %v512_v38 = vld [vmem:[#allocation7 + $0x40] sm:$0xff]  ;;  %v513_v39 = vld [vmem:[#allocation7 + $0x48] sm:$0xff]  ;;  %v514_v41 = vld [vmem:[#allocation7 + $0x50] sm:$0xff] }
 0x13b   :  { %v1263_v44 = vpop.f32.mrb[7].mxu1  ;;  %v1639_v40 = vpack.c.bf16 %v513_v39, %v512_v38  ;;  %v719_v38 = vld [vmem:[#allocation5 + $0x1b8] sm:$0xff]  ;;  %v702_v39 = vld [vmem:[#allocation5 + $0x130] sm:$0xff] }
 0x13c   :  { %v1264_v46 = vadd.f32 %v1263_v44, %v1262_v42  ;;  %v250_v47 = vadd.f32 %v1220_v43, %v167_v17  ;;  %v515_v42 = vld [vmem:[#allocation7 + $0x58] sm:$0xff]  ;;  %v516_v44 = vld [vmem:[#allocation7 + $0x60] sm:$0xff] }
 0x13d   :  { %v1643_v43 = vpack.c.bf16 %v515_v42, %v514_v41 }
 0x13e   :  { %v335_v49 = vadd.f32 %v1264_v46, %v250_v47  ;;  %v518_v47 = vld [vmem:[#allocation7 + $0x70] sm:$0xff] }
 0x14c   :  { %v1447_v50 = vpop.f32.mrb[8].mxu0 }
 0x14d   :  { %v2047_v51 = vadd.f32 %v1447_v50, %v325_v37  ;;  %v404_v52 = vpop.f32.mrb[9].mxu0  ;;  %v1635_v37 = vpack.c.bf16 %v511_v34, %v510_v33  ;;  %v670_v34 = vld [vmem:[#allocation5 + $0x30] sm:$0xff] }
 0x14e   :  { %v2049_v53 = vadd.f32 %v404_v52, %v320_v29  ;;  %v1627_v29 = vpack.c.bf16 %v507_v28, %v506_v26  ;;  %v680_v52 = vld [vmem:[#allocation5 + $0x80] sm:$0xff]  ;;  %v717_v26 = vld [vmem:[#allocation5 + $0x1a8] sm:$0xff] }
 0x14f   :  { %v433_v54 = vmul.f32 %v2047_v51, %v2047_v51  ;;  %v701_v28 = vld [vmem:[#allocation5 + $0x128] sm:$0xff] }
 0x150   :  { %v432_v56 = vmul.f32 %v2049_v53, %v2049_v53  ;;  %v1450_v57 = vpop.f32.mrb[10].mxu0  ;;  %v423_v60 = vadd.f32 %v2047_v51, %v2049_v53  ;;  %1628 = vmatprep.subr.bf16.mxu1 %v1627_v29  ;;  %v1697_v30 = vpack.c.bf16 %v701_v28, %v700_v27  ;;  %v679_v27 = vld [vmem:[#allocation5 + $0x78] sm:$0xff]  ;;  %v726_v28 = vld [vmem:[#allocation5 + $0x1f0] sm:$0xff] }
 0x151   :  { %v2055_v58 = vadd.f32 %v1450_v57, %v335_v49  ;;  %v414_v59 = vpop.f32.mrb[11].mxu0  ;;  %1630 = vmatpush3.bf16.msra.mxu1 %v1627_v29  ;;  %v519_v49 = vld [vmem:[#allocation7 + $0x78] sm:$0xff]  ;;  %v664_v57 = vld [vmem:[#allocation5] sm:$0xff]  ;;  %v1695_v29 = vpack.c.bf16 %v717_v26, %v716_v24 }
 0x152   :  { %v2059_v61 = vadd.f32 %v414_v59, %v330_v45  ;;  %v436_v63 = vadd.f32 %v433_v54, %v432_v56  ;;  %1632 = vmatprep.subr.bf16.mxu1 %v1631_v32  ;;  %v517_v45 = vld [vmem:[#allocation7 + $0x68] sm:$0xff]  ;;  %v1651_v50 = vpack.c.bf16 %v519_v49, %v518_v47  ;;  %v720_v49 = vld [vmem:[#allocation5 + $0x1c0] sm:$0xff]  ;;  %v695_v24 = vld [vmem:[#allocation5 + $0xf8] sm:$0xff] }
 0x153   :  { %v435_v2 = vmul.f32 %v2055_v58, %v2055_v58  ;;  %v1647_v46 = vpack.c.bf16 %v517_v45, %v516_v44  ;;  %v681_v54 = vld [vmem:[#allocation5 + $0x88] sm:$0xff] }
 0x154   :  { %v424_v0 = vadd.f32 %v423_v60, %v2059_v61  ;;  %v434_v1 = vmul.f32 %v2059_v61, %v2059_v61  ;;  %v1655_v56 = vpack.c.bf16 %v681_v54, %v680_v52  ;;  %v665_v59 = vld [vmem:[#allocation5 + $0x8] sm:$0xff]  ;;  %v712_v60 = vld [vmem:[#allocation5 + $0x180] sm:$0xff] }
 0x155   :  { %1634 = vmatpush3.bf16.msra.mxu1 %v1631_v32  ;;  %v687_v32 = vld [vmem:[#allocation5 + $0xb8] sm:$0xff]  ;;  %v689_v44 = vld [vmem:[#allocation5 + $0xc8] sm:$0xff]  ;;  %v704_v54 = vld [vmem:[#allocation5 + $0x140] sm:$0xff] }
 0x156   :  { %v425_v3 = vadd.f32 %v424_v0, %v2055_v58  ;;  %v437_v4 = vadd.f32 %v436_v63, %v434_v1  ;;  %1636 = vmatprep.subr.bf16.mxu1 %v1635_v37  ;;  %v1657_v63 = vpack.c.bf16 %v665_v59, %v664_v57  ;;  %v713_v0 = vld [vmem:[#allocation5 + $0x188] sm:$0xff]  ;;  %v696_v1 = vld [vmem:[#allocation5 + $0x100] sm:$0xff]  ;;  %1656 = vmatprep.subr.bf16.mxu0 %v1655_v56 }
 0x157   :  { %v1667_v33 = vpack.c.bf16 %v687_v32, %v686_v31  ;;  %v673_v47 = vld [vmem:[#allocation5 + $0x48] sm:$0xff]  ;;  %v710_v32 = vld [vmem:[#allocation5 + $0x170] sm:$0xff] }
 0x158   :  { %v426_v5 = vrot.slane %v425_v3, 4  ;;  %v438_v6 = vadd.f32 %v437_v4, %v435_v2  ;;  %v697_v2 = vld [vmem:[#allocation5 + $0x108] sm:$0xff]  ;;  %1658 = vmatpush3.bf16.msra.mxu0 %v1657_v63  ;;  %v691_v63 = vld [vmem:[#allocation5 + $0xd8] sm:$0xff] }
 0x159   :  { %1638 = vmatpush3.bf16.msra.mxu1 %v1635_v37  ;;  %v1689_v4 = vpack.c.bf16 %v697_v2, %v696_v1  ;;  %v721_v52 = vld [vmem:[#allocation5 + $0x1c8] sm:$0xff]  ;;  %v674_v1 = vld [vmem:[#allocation5 + $0x50] sm:$0xff]  ;;  %v675_v2 = vld [vmem:[#allocation5 + $0x58] sm:$0xff] }
 0x15a   :  { %v427_v7 = vadd.f32 %v426_v5, %v425_v3  ;;  %v439_v8 = vrot.slane %v438_v6, 4  ;;  %1640 = vmatprep.subr.bf16.mxu1 %v1639_v40  ;;  %v1687_v3 = vpack.c.bf16 %v713_v0, %v712_v60  ;;  %v682_v5 = vld [vmem:[#allocation5 + $0x90] sm:$0xff]  ;;  %v705_v56 = vld [vmem:[#allocation5 + $0x148] sm:$0xff]  ;;  %v1703_v57 = vpack.c.bf16 %v721_v52, %v720_v49 }
 0x15b   :  { %v1705_v59 = vpack.c.bf16 %v705_v56, %v704_v54  ;;  %v690_v60 = vld [vmem:[#allocation5 + $0xd0] sm:$0xff] }
 0x15c   :  { %v428_v9 = vrot.slane %v427_v7, 2  ;;  %v440_v10 = vadd.f32 %v439_v8, %v438_v6  ;;  %v666_v6 = vld [vmem:[#allocation5 + $0x10] sm:$0xff]  ;;  %v1675_v0 = vpack.c.bf16 %v691_v63, %v690_v60 }
 0x15d   :  { %1642 = vmatpush3.bf16.msra.mxu1 %v1639_v40  ;;  %v703_v40 = vld [vmem:[#allocation5 + $0x138] sm:$0xff] }
 0x15e   :  { %v429_v11 = vadd.f32 %v428_v9, %v427_v7  ;;  %v441_v12 = vrot.slane %v440_v10, 2  ;;  %1644 = vmatprep.subr.bf16.mxu1 %v1643_v43  ;;  %v714_v7 = vld [vmem:[#allocation5 + $0x190] sm:$0xff]  ;;  %v715_v9 = vld [vmem:[#allocation5 + $0x198] sm:$0xff]  ;;  %v1701_v42 = vpack.c.bf16 %v703_v40, %v702_v39 }
 0x160   :  { %v430_v16 = vrot.slane %v429_v11, 1  ;;  %v442_v17 = vadd.f32 %v441_v12, %v440_v10  ;;  %v698_v10 = vld [vmem:[#allocation5 + $0x110] sm:$0xff]  ;;  %v1691_v12 = vpack.c.bf16 %v715_v9, %v714_v7  ;;  %v692_v7 = vld [vmem:[#allocation5 + $0xe0] sm:$0xff] }
 0x161   :  { %1646 = vmatpush3.bf16.msra.mxu1 %v1643_v43  ;;  %v688_v43 = vld [vmem:[#allocation5 + $0xc0] sm:$0xff] }
 0x162   :  { %v443_v18 = vrot.slane %v442_v17, 1  ;;  %v431_v19 = vadd.f32 %v430_v16, %v429_v11  ;;  %1648 = vmatprep.subr.bf16.mxu1 %v1647_v46  ;;  %v699_v11 = vld [vmem:[#allocation5 + $0x118] sm:$0xff]  ;;  %v1671_v45 = vpack.c.bf16 %v689_v44, %v688_v43 }
 0x163   :  { %v1693_v16 = vpack.c.bf16 %v699_v11, %v698_v10  ;;  %v676_v10 = vld [vmem:[#allocation5 + $0x60] sm:$0xff]  ;;  %v677_v11 = vld [vmem:[#allocation5 + $0x68] sm:$0xff] }
 0x164   :  { %v444_v20 = vadd.f32 %v443_v18, %v442_v17  ;;  %v684_v18 = vld [vmem:[#allocation5 + $0xa0] sm:$0xff] }
 0x165   :  { %1650 = vmatpush3.bf16.msra.mxu1 %v1647_v46  ;;  %v672_v46 = vld [vmem:[#allocation5 + $0x40] sm:$0xff] }
 0x166   :  { %v446_v21 = vsel %vm445_vm0, %v431_v19, %v444_v20  ;;  %1652 = vmatprep.subr.bf16.mxu1 %v1651_v50  ;;  %v685_v19 = vld [vmem:[#allocation5 + $0xa8] sm:$0xff] }
 0x167   :  { %447 = vrot.lane.b32.xlu0 %v446_v21, %s1878_s6 }
 0x169   :  { %1654 = vmatpush3.bf16.msra.mxu1 %v1651_v50  ;;  %v1673_v50 = vpack.c.bf16 %v673_v47, %v672_v46 }
 0x16a   :  { %1688 = vmatprep.subr.bf16.mxu1 %v1687_v3  ;;  %v722_v3 = vld [vmem:[#allocation5 + $0x1d0] sm:$0xff] }
 0x16c   :  { %1484 = vmatmul.mubr.f32.vlgmr.msra.gmra.mrb[8].mxu1 %v1990_v48  ;;  %v683_v48 = vld [vmem:[#allocation5 + $0x98] sm:$0xff] }
 0x16d   :  { %1486 = vmatprep.mubr.f32.mxu1 %v2005_v55  ;;  %v1659_v55 = vpack.c.bf16 %v683_v48, %v682_v5  ;;  %1690 = vmatpush3.bf16.msra.mxu1 %v1689_v4  ;;  %v1677_v4 = vpack.c.bf16 %v675_v2, %v674_v1  ;;  %v723_v5 = vld [vmem:[#allocation5 + $0x1d8] sm:$0xff]  ;;  %v706_v48 = vld [vmem:[#allocation5 + $0x150] sm:$0xff] }
 0x16e   :  { %1692 = vmatprep.subr.bf16.mxu1 %v1691_v12  ;;  %v724_v12 = vld [vmem:[#allocation5 + $0x1e0] sm:$0xff] }
 0x16f   :  { %1660 = vmatprep.subr.bf16.mxu0 %v1659_v55  ;;  %v707_v55 = vld [vmem:[#allocation5 + $0x158] sm:$0xff] }
 0x170   :  { %1487 = vmatmul.mubr.f32.gmra.mrb[10].mxu1 %v2020_v62  ;;  %v667_v62 = vld [vmem:[#allocation5 + $0x18] sm:$0xff] }
 0x171   :  { %v1661_v8 = vpack.c.bf16 %v667_v62, %v666_v6  ;;  %1694 = vmatpush3.bf16.msra.mxu1 %v1693_v16  ;;  %v1707_v6 = vpack.c.bf16 %v723_v5, %v722_v3  ;;  %v1709_v62 = vpack.c.bf16 %v707_v55, %v706_v48  ;;  %v1681_v16 = vpack.c.bf16 %v677_v11, %v676_v10 }
 0x172   :  { %1696 = vmatprep.subr.bf16.mxu1 %v1695_v29  ;;  %v727_v29 = vld [vmem:[#allocation5 + $0x1f8] sm:$0xff] }
 0x173   :  { %1662 = vmatpush3.bf16.msra.mxu0 %v1661_v8  ;;  %v693_v8 = vld [vmem:[#allocation5 + $0xe8] sm:$0xff]  ;;  %v1715_v31 = vpack.c.bf16 %v727_v29, %v726_v28 }
 0x174   :  { %v1679_v9 = vpack.c.bf16 %v693_v8, %v692_v7  ;;  %v731_v7 = vld [vmem:[#allocation5 + $0x218] sm:$0xff]  ;;  %v733_v28 = vld [vmem:[#allocation5 + $0x228] sm:$0xff] }
 0x175   :  { %1698 = vmatpush3.bf16.msra.mxu1 %v1697_v30 }
 0x1d9   :  { %v448_v22 = vpop.permute.xlu0 %447 }
 0x1da   :  { %v449_v23 = vadd.f32 %v448_v22, %v446_v21  ;;  %v1663_v21 = vpack.c.bf16 %v685_v19, %v684_v18  ;;  %v668_v22 = vld [vmem:[#allocation5 + $0x20] sm:$0xff]  ;;  %v709_v19 = vld [vmem:[#allocation5 + $0x168] sm:$0xff] }
 0x1db   :  { %v708_v18 = vld [vmem:[#allocation5 + $0x160] sm:$0xff] }
 0x1dc   :  { %450 = vrot.lane.b32.xlu0 %v449_v23, %s1880_s0  ;;  %1664 = vmatprep.subr.bf16.mxu0 %v1663_v21 }
 0x24e   :  { %v451_v35 = vpop.permute.xlu0 %450 }
 0x24f   :  { %v2070_v36 = vadd.f32 %v451_v35, %v449_v23  ;;  %v669_v23 = vld [vmem:[#allocation5 + $0x28] sm:$0xff]  ;;  %v671_v35 = vld [vmem:[#allocation5 + $0x38] sm:$0xff] }
 0x250   :  { %v1665_v25 = vpack.c.bf16 %v669_v23, %v668_v22  ;;  %v1669_v37 = vpack.c.bf16 %v671_v35, %v670_v34  ;;  %v1713_v22 = vpack.c.bf16 %v709_v19, %v708_v18  ;;  %v694_v23 = vld [vmem:[#allocation5 + $0xf0] sm:$0xff]  ;;  %v728_v35 = vld [vmem:[#allocation5 + $0x200] sm:$0xff] }
 0x251   :  { %453 = vrot.lane.b32.xlu1 %v2070_v36, %s1881_s20  ;;  %v1683_v26 = vpack.c.bf16 %v695_v24, %v694_v23 }
 0x252   :  { %1666 = vmatpush3.bf16.msra.mxu0 %v1665_v25  ;;  %v678_v25 = vld [vmem:[#allocation5 + $0x70] sm:$0xff] }
 0x253   :  { %1668 = vmatprep.subr.bf16.mxu0 %v1667_v33  ;;  %v1685_v30 = vpack.c.bf16 %v679_v27, %v678_v25  ;;  %v711_v33 = vld [vmem:[#allocation5 + $0x178] sm:$0xff]  ;;  %v732_v27 = vld [vmem:[#allocation5 + $0x220] sm:$0xff] }
 0x254   :  { %v1717_v34 = vpack.c.bf16 %v711_v33, %v710_v32  ;;  %v1727_v32 = vpack.c.bf16 %v733_v28, %v732_v27 }
 0x256   :  { %1670 = vmatpush3.bf16.msra.mxu0 %v1669_v37 }
 0x257   :  { %1672 = vmatprep.subr.bf16.mxu0 %v1671_v45 }
 0x25a   :  { %1674 = vmatpush3.bf16.msra.mxu0 %v1673_v50  ;;  %v486_v50 = vsub.s32 2, %v2035_v13 }
 0x25b   :  { %1676 = vmatprep.subr.bf16.mxu0 %v1675_v0 }
 0x25e   :  { %1678 = vmatpush3.bf16.msra.mxu0 %v1677_v4 }
 0x25f   :  { %1680 = vmatprep.subr.bf16.mxu0 %v1679_v9 }
 0x262   :  { %1682 = vmatpush3.bf16.msra.mxu0 %v1681_v16 }
 0x263   :  { %1684 = vmatprep.subr.bf16.mxu0 %v1683_v26 }
 0x266   :  { %1686 = vmatpush3.bf16.msra.mxu0 %v1685_v30 }
 0x2c3   :  { %v454_v17 = vpop.permute.xlu1 %453 }
 0x2c4   :  { %v2078_v20 = vadd.f32 %v454_v17, %v2070_v36  ;;  %v718_v36 = vld [vmem:[#allocation5 + $0x1b0] sm:$0xff]  ;;  %v725_v17 = vld [vmem:[#allocation5 + $0x1e8] sm:$0xff] }
 0x2c5   :  { %v1699_v41 = vpack.c.bf16 %v719_v38, %v718_v36  ;;  %v1711_v21 = vpack.c.bf16 %v725_v17, %v724_v12  ;;  %v729_v36 = vld [vmem:[#allocation5 + $0x208] sm:$0xff] }
 0x2c6   :  { %456 = vrot.lane.b32.xlu1 %v2078_v20, %s1882_s22  ;;  %v2082_v37 = vpack.c.bf16 %v729_v36, %v728_v35  ;;  %v734_v35 = vld [vmem:[#allocation5 + $0x230] sm:$0xff]  ;;  %v735_v36 = vld [vmem:[#allocation5 + $0x238] sm:$0xff] }
 0x2c7   :  { %1700 = vmatprep.subr.bf16.mxu1 %v1699_v41  ;;  %v2087_v41 = vpop.f32.mrb[8].mxu1 }
 0x2c8   :  { %1702 = vmatpush3.bf16.msra.mxu1 %v1701_v42  ;;  %1720 = vmatprep.subr.bf16.mxu0 %v2082_v37  ;;  %v2089_v43 = vpop.f32.mrb[9].mxu1 }
 0x2c9   :  { %1704 = vmatprep.subr.bf16.mxu1 %v1703_v57  ;;  %v2091_v45 = vpop.f32.mrb[10].mxu1  ;;  %v487_v57 = vrot.slane %v2043_v15, %v486_v50 }
 0x2ca   :  { %v2093_v47 = vpop.f32.mrb[11].mxu1 }
 0x2cc   :  { %1706 = vmatpush3.bf16.msra.mxu1 %v1705_v59 }
 0x2cd   :  { %1708 = vmatprep.subr.bf16.mxu1 %v1707_v6 }
 0x2d0   :  { %1710 = vmatpush3.bf16.msra.mxu1 %v1709_v62 }
 0x2d1   :  { %1712 = vmatprep.subr.bf16.mxu1 %v1711_v21 }
 0x2d4   :  { %1714 = vmatpush3.bf16.msra.mxu1 %v1713_v22 }
 0x2d5   :  { %1716 = vmatprep.subr.bf16.mxu1 %v1715_v31 }
 0x2d8   :  { %1718 = vmatpush3.bf16.msra.mxu1 %v1717_v34 }
 0x2d9   :  { %1751 = vmatprep.subr.bf16.mxu1 %v2082_v37 }
 0x338   :  { %v457_v38 = vpop.permute.xlu1 %456 }
 0x339   :  { %v458_v39 = vadd.f32 %v457_v38, %v2078_v20  ;;  %v478_v20 = vsub.s32 1, %v2035_v13 }
 0x33b   :  { %v459_v40 = vmul.f32 0.001953125, %v458_v39 }
 0x33d   :  { %v460_v42 = vmul.f32 %v459_v40, %v459_v40  ;;  %v468_v52 = vrot.slane %v459_v40, %v2038_v14 }
 0x33f   :  { %v462_v44 = vrot.slane %v460_v42, 7  ;;  %v469_v59 = vsub.f32 %v2049_v53, %v468_v52  ;;  %v470_v60 = vsub.f32 %v2047_v51, %v468_v52  ;;  %v471_v63 = vsub.f32 %v2059_v61, %v468_v52  ;;  %v730_v61 = vld [vmem:[#allocation5 + $0x210] sm:$0xff] }
 0x340   :  { %v472_v0 = vsub.f32 %v2055_v58, %v468_v52  ;;  %v1723_v22 = vpack.c.bf16 %v731_v7, %v730_v61 }
 0x341   :  { %v464_v46 = vsub.f32 %v459_v40, %v462_v44  ;;  %v1731_v40 = vpack.c.bf16 %v735_v36, %v734_v35  ;;  %v736_v44 = vld [vmem:[#allocation5 + $0x240] sm:$0xff] }
 0x343   :  { %v473_v49 = vadd.f32 1e-05, %v464_v46  ;;  %v737_v46 = vld [vmem:[#allocation5 + $0x248] sm:$0xff] }
 0x345   :  { %1776 = vrsqrt.f32 %v473_v49 }
 0x34f   :  { %v1777_v54 = vpop.eup %1776 }
 0x350   :  { %v475_v56 = vmul.f32 %v1777_v54, %v2043_v15 }
 0x352   :  { %v479_v1 = vrot.slane %v475_v56, %v478_v20 }
 0x354   :  { %v480_v2 = vmul.f32 %v479_v1, %v469_v59  ;;  %v481_v3 = vmul.f32 %v479_v1, %v470_v60  ;;  %v482_v4 = vmul.f32 %v479_v1, %v471_v63  ;;  %v483_v5 = vmul.f32 %v479_v1, %v472_v0  ;;  %v738_v63 = vld [vmem:[#allocation5 + $0x250] sm:$0xff]  ;;  %v739_v0 = vld [vmem:[#allocation5 + $0x258] sm:$0xff] }
 0x355   :  { %v1735_v59 = vpack.c.bf16 %v737_v46, %v736_v44 }
 0x356   :  { %v488_v48 = vadd.f32 %v487_v57, %v480_v2  ;;  %v490_v55 = vadd.f32 %v487_v57, %v482_v4  ;;  %v489_v6 = vadd.f32 %v487_v57, %v481_v3  ;;  %v491_v62 = vadd.f32 %v487_v57, %v483_v5  ;;  %v740_v4 = vld [vmem:[#allocation5 + $0x260] sm:$0xff]  ;;  %v741_v5 = vld [vmem:[#allocation5 + $0x268] sm:$0xff] }
 0x357   :  { %v1739_v3 = vpack.c.bf16 %v739_v0, %v738_v63 }
 0x358   :  { %vm492_vm3 = vcmp.gt.f32.partialorder %v488_v48, 0.0  ;;  %v496_v53 = vmul.f32 0.2, %v488_v48  ;;  %vm493_vm4 = vcmp.gt.f32.partialorder %v489_v6, 0.0  ;;  %v497_v51 = vmul.f32 0.2, %v489_v6 }
 0x359   :  { %v498_v58 = vmul.f32 0.2, %v490_v55  ;;  %v499_v8 = vmul.f32 0.2, %v491_v62  ;;  %vm494_vm6 = vcmp.gt.f32.partialorder %v490_v55, 0.0  ;;  %vm495_vm7 = vcmp.gt.f32.partialorder %v491_v62, 0.0 }
 0x35a   :  { %v2108_v9 = vsel %vm492_vm3, %v488_v48, %v496_v53  ;;  %v2115_v11 = vsel %vm493_vm4, %v489_v6, %v497_v51  ;;  %v1743_v48 = vpack.c.bf16 %v741_v5, %v740_v4  ;;  %v743_v6 = vld [vmem:[#allocation5 + $0x278] sm:$0xff]  ;;  %v746_v53 = vsub.s32 3, %v2035_v13 }
 0x35b   :  { %v626_v12 = vrot.slane %v2108_v9, 7  ;;  %v614_v16 = vrot.slane %v2108_v9, 6  ;;  %v639_v18 = vrot.slane %v2108_v9, 1  ;;  %v640_v19 = vrot.slane %v2115_v11, 1 }
 0x35c   :  { %v627_v21 = vrot.slane %v2115_v11, 7  ;;  %v615_v24 = vrot.slane %v2115_v11, 6  ;;  %v502_v25 = vsel %vm494_vm6, %v490_v55, %v498_v58  ;;  %v2131_v26 = vsel %vm495_vm7, %v491_v62, %v499_v8  ;;  %v742_v55 = vld [vmem:[#allocation5 + $0x270] sm:$0xff] }
 0x35d   :  { %1165 = vmatprep.mubr.msk.f32.mxu0 %vm2111_vm5, %v626_v12  ;;  %v641_v23 = vsel %vm638_vm2, %v639_v18, %v640_v19  ;;  %v642_v30 = vrot.slane %v502_v25, 1  ;;  %v643_v31 = vrot.slane %v2131_v26, 1  ;;  %v629_v34 = vrot.slane %v502_v25, 7 }
 0x35e   :  { %1167 = vmatmul.mubr.msk.f32.vlgmr.msra.gmra.mrb[12].mxu0 %vm2120_vm8, %v614_v16  ;;  %897 = vmatprep.mubr.f32.mxu1 %v641_v23  ;;  %v628_v29 = vsel %vm445_vm0, %v626_v12, %v627_v21  ;;  %v616_v33 = vsel %vm613_vm1, %v614_v16, %v615_v24  ;;  %v630_v38 = vrot.slane %v2131_v26, 7  ;;  %v618_v42 = vrot.slane %v2131_v26, 6 }
 0x35f   :  { %1722 = vmatpush3.bf16.msra.mxu0 %v2082_v37  ;;  %817 = vmatprep.mubr.f32.mxu0 %v628_v29  ;;  %v644_v39 = vsel %vm638_vm2, %v642_v30, %v643_v31  ;;  %v652_v52 = vrot.slane %v2108_v9, 2  ;;  %v653_v54 = vrot.slane %v2115_v11, 2  ;;  %v655_v56 = vrot.slane %v502_v25, 2 }
 0x360   :  { %898 = vmatmul.mubr.f32.vlgmr.msra.gmra.mrb[12].mxu1 %v2108_v9  ;;  %1724 = vmatprep.subr.bf16.mxu0 %v1723_v22  ;;  %v631_v49 = vsel %vm445_vm0, %v629_v34, %v630_v38  ;;  %v656_v57 = vrot.slane %v2131_v26, 2  ;;  %v1747_v62 = vpack.c.bf16 %v743_v6, %v742_v55  ;;  %v747_v61 = vrot.slane %v2043_v15, %v746_v53 }
 0x361   :  { %1759 = vmatpush3.bf16.msra.mxu1 %v2082_v37  ;;  %1172 = vmatprep.mubr.msk.f32.mxu1 %vm638_vm2, %v640_v19  ;;  %v617_v37 = vrot.slane %v502_v25, 6  ;;  %v654_v1 = vsel %vm651_vm9, %v652_v52, %v653_v54 }
 0x362   :  { %818 = vmatmul.mubr.f32.gmra.mrb[14].mxu0 %v616_v33  ;;  %1752 = vmatprep.subr.bf16.mxu1 %v1723_v22  ;;  %v657_v2 = vsel %vm651_vm9, %v655_v56, %v656_v57 }
 0x363   :  { %1726 = vmatpush3.bf16.msra.mxu0 %v1723_v22  ;;  %1169 = vmatprep.mubr.msk.f32.mxu0 %vm2111_vm5, %v629_v34  ;;  %v619_v60 = vsel %vm613_vm1, %v617_v37, %v618_v42 }
 0x364   :  { %903 = vmatmul.mubr.f32.gmra.mrb[14].mxu1 %v2115_v11  ;;  %1728 = vmatprep.subr.bf16.mxu0 %v1727_v32 }
 0x365   :  { %1760 = vmatpush3.bf16.msra.mxu1 %v1723_v22  ;;  %907 = vmatprep.mubr.f32.mxu1 %v644_v39  ;;  %v522_v22 = vsub.s32 6, %v2035_v13 }
 0x366   :  { %1171 = vmatmul.mubr.msk.f32.gmra.mrb[16].mxu0 %vm2120_vm8, %v617_v37  ;;  %1753 = vmatprep.subr.bf16.mxu1 %v1727_v32 }
 0x367   :  { %1730 = vmatpush3.bf16.msra.mxu0 %v1727_v32  ;;  %827 = vmatprep.mubr.f32.mxu0 %v631_v49 }
 0x368   :  { %908 = vmatmul.mubr.f32.gmra.mrb[16].mxu1 %v502_v25  ;;  %1732 = vmatprep.subr.bf16.mxu0 %v1731_v40 }
 0x369   :  { %1761 = vmatpush3.bf16.msra.mxu1 %v1727_v32  ;;  %1173 = vmatprep.mubr.msk.f32.mxu1 %vm638_vm2, %v643_v31  ;;  %v523_v31 = vrot.slane %v2043_v15, %v522_v22 }
 0x36a   :  { %828 = vmatmul.mubr.f32.gmra.mrb[18].mxu0 %v619_v60  ;;  %1754 = vmatprep.subr.bf16.mxu1 %v1731_v40 }
 0x36b   :  { %1734 = vmatpush3.bf16.msra.mxu0 %v1731_v40  ;;  %1521 = vmatprep.mubr.f32.mxu0 %v654_v1  ;;  %v2171_v42 = vadd.f32 %v2089_v43, %v523_v31 }
 0x36c   :  { %913 = vmatmul.mubr.f32.gmra.mrb[18].mxu1 %v2131_v26  ;;  %1736 = vmatprep.subr.bf16.mxu0 %v1735_v59 }
 0x36d   :  { %1762 = vmatpush3.bf16.msra.mxu1 %v1731_v40  ;;  %1524 = vmatprep.mubr.f32.mxu1 %v657_v2  ;;  %v2168_v40 = vadd.f32 %v2087_v41, %v523_v31  ;;  %v1034_v52 = vmul.f32 %v2171_v42, %v2171_v42 }
 0x36e   :  { %1755 = vmatprep.subr.bf16.mxu1 %v1735_v59 }
 0x36f   :  { %1738 = vmatpush3.bf16.msra.mxu0 %v1735_v59  ;;  %v1035_v15 = vmul.f32 %v2168_v40, %v2168_v40  ;;  %v1025_v56 = vadd.f32 %v2168_v40, %v2171_v42 }
 0x370   :  { %1740 = vmatprep.subr.bf16.mxu0 %v1739_v3 }
 0x371   :  { %1763 = vmatpush3.bf16.msra.mxu1 %v1735_v59  ;;  %v1038_v41 = vadd.f32 %v1035_v15, %v1034_v52 }
 0x372   :  { %1756 = vmatprep.subr.bf16.mxu1 %v1739_v3 }
 0x373   :  { %1742 = vmatpush3.bf16.msra.mxu0 %v1739_v3 }
 0x374   :  { %1744 = vmatprep.subr.bf16.mxu0 %v1743_v48 }
 0x375   :  { %1764 = vmatpush3.bf16.msra.mxu1 %v1739_v3 }
 0x376   :  { %1757 = vmatprep.subr.bf16.mxu1 %v1743_v48 }
 0x377   :  { %1746 = vmatpush3.bf16.msra.mxu0 %v1743_v48 }
 0x378   :  { %1748 = vmatprep.subr.bf16.mxu0 %v1747_v62 }
 0x379   :  { %1765 = vmatpush3.bf16.msra.mxu1 %v1743_v48 }
 0x37a   :  { %1758 = vmatprep.subr.bf16.mxu1 %v1747_v62 }
 0x37b   :  { %1750 = vmatpush3.bf16.msra.mxu0 %v1747_v62 }
 0x37d   :  { %1766 = vmatpush3.bf16.msra.mxu1 %v1747_v62 }
 0x37e   :  { %1522 = vmatmul.mubr.msk.f32.vlgmr.msra.gmra.mrb[20].mxu0 %vm651_vm9, %v653_v54  ;;  %v2178_v54 = vadd.f32 %v2093_v47, %v523_v31 }
 0x380   :  { %1525 = vmatmul.mubr.msk.f32.vlgmr.msra.gmra.mrb[20].mxu1 %vm651_vm9, %v656_v57  ;;  %v2183_v57 = vadd.f32 %v2091_v45, %v523_v31  ;;  %v1036_v43 = vmul.f32 %v2178_v54, %v2178_v54  ;;  %v1026_v59 = vadd.f32 %v1025_v56, %v2178_v54 }
 0x382   :  { %v1037_v60 = vmul.f32 %v2183_v57, %v2183_v57  ;;  %v1039_v63 = vadd.f32 %v1038_v41, %v1036_v43  ;;  %v1027_v0 = vadd.f32 %v1026_v59, %v2183_v57 }
 0x384   :  { %v1040_v47 = vadd.f32 %v1039_v63, %v1037_v60  ;;  %v1028_v5 = vrot.slane %v1027_v0, 4 }
 0x431   :  { %v1337_v51 = vpop.f32.mrb[12].mxu0 }
 0x432   :  { %v1338_v7 = vpop.f32.mrb[13].mxu0 }
 0x433   :  { %v1339_v58 = vadd.f32 %v1338_v7, %v1337_v51  ;;  %v1381_v8 = vpop.f32.mrb[12].mxu1  ;;  %v1041_v7 = vrot.slane %v1040_v47, 4 }
 0x434   :  { %v1382_v9 = vpop.f32.mrb[13].mxu1 }
 0x435   :  { %v815_v10 = vadd.f32 %v1339_v58, %v747_v61  ;;  %v1383_v11 = vadd.f32 %v1382_v9, %v1381_v8  ;;  %v1340_v12 = vpop.f32.mrb[14].mxu0 }
 0x436   :  { %v1341_v16 = vpop.f32.mrb[15].mxu0 }
 0x437   :  { %v1342_v17 = vadd.f32 %v1341_v16, %v1340_v12  ;;  %v1384_v18 = vpop.f32.mrb[14].mxu1  ;;  %v900_v19 = vadd.f32 %v1383_v11, %v815_v10  ;;  %v1029_v10 = vadd.f32 %v1028_v5, %v1027_v0  ;;  %v1780_v5 = vld [vmem:[%s2258_s4] sm:$0xff] }
 0x438   :  { %v1385_v21 = vpop.f32.mrb[15].mxu1 }
 0x439   :  { %v820_v23 = vadd.f32 %v1342_v17, %v747_v61  ;;  %v1386_v24 = vadd.f32 %v1385_v21, %v1384_v18  ;;  %v1343_v25 = vpop.f32.mrb[16].mxu0  ;;  %v1042_v17 = vadd.f32 %v1041_v7, %v1040_v47  ;;  %v1030_v21 = vrot.slane %v1029_v10, 2 }
 0x43a   :  { %v1344_v26 = vpop.f32.mrb[17].mxu0 }
 0x43b   :  { %v1345_v27 = vadd.f32 %v1344_v26, %v1343_v25  ;;  %v1387_v28 = vpop.f32.mrb[16].mxu1  ;;  %v905_v29 = vadd.f32 %v1386_v24, %v820_v23  ;;  %v1043_v24 = vrot.slane %v1042_v17, 2 }
 0x43c   :  { %v1388_v30 = vpop.f32.mrb[17].mxu1 }
 0x43d   :  { %v825_v32 = vadd.f32 %v1345_v27, %v747_v61  ;;  %v1389_v33 = vadd.f32 %v1388_v30, %v1387_v28  ;;  %v1346_v34 = vpop.f32.mrb[18].mxu0  ;;  %v1031_v27 = vadd.f32 %v1030_v21, %v1029_v10  ;;  %v1044_v30 = vadd.f32 %v1043_v24, %v1042_v17 }
 0x43e   :  { %v1347_v35 = vpop.f32.mrb[19].mxu0 }
 0x43f   :  { %v1348_v36 = vadd.f32 %v1347_v35, %v1346_v34  ;;  %v1390_v38 = vpop.f32.mrb[18].mxu1  ;;  %v910_v39 = vadd.f32 %v1389_v33, %v825_v32  ;;  %v1032_v33 = vrot.slane %v1031_v27, 1  ;;  %v1045_v35 = vrot.slane %v1044_v30, 1 }
 0x440   :  { %v1391_v37 = vpop.f32.mrb[19].mxu1 }
 0x441   :  { %v830_v44 = vadd.f32 %v1348_v36, %v747_v61  ;;  %v1392_v46 = vadd.f32 %v1391_v37, %v1390_v38  ;;  %v1046_v37 = vadd.f32 %v1045_v35, %v1044_v30 }
 0x443   :  { %v915_v49 = vadd.f32 %v1392_v46, %v830_v44 }
 0x451   :  { %v1523_v1 = vpop.f32.mrb[20].mxu0 }
 0x452   :  { %v2191_v2 = vadd.f32 %v1523_v1, %v905_v29  ;;  %v984_v3 = vpop.f32.mrb[21].mxu0 }
 0x453   :  { %v2193_v4 = vadd.f32 %v984_v3, %v900_v19  ;;  %v1526_v45 = vpop.f32.mrb[20].mxu1 }
 0x454   :  { %v1013_v48 = vmul.f32 %v2191_v2, %v2191_v2  ;;  %v2197_v55 = vadd.f32 %v1526_v45, %v915_v49  ;;  %v994_v6 = vpop.f32.mrb[21].mxu1 }
 0x455   :  { %v1003_v62 = vadd.f32 %v2191_v2, %v2193_v4  ;;  %v1012_v51 = vmul.f32 %v2193_v4, %v2193_v4  ;;  %v2203_v61 = vadd.f32 %v994_v6, %v910_v39  ;;  %v1033_v39 = vadd.f32 %v1032_v33, %v1031_v27 }
 0x456   :  { %v1015_v11 = vmul.f32 %v2197_v55, %v2197_v55  ;;  %v1107_v6 = vrot.slane %v1780_v5, 4 }
 0x457   :  { %v1016_v58 = vadd.f32 %v1013_v48, %v1012_v51  ;;  %v1004_v8 = vadd.f32 %v1003_v62, %v2203_v61  ;;  %v1014_v9 = vmul.f32 %v2203_v61, %v2203_v61  ;;  %v1080_v48 = vrot.slane %v1780_v5, 3 }
 0x458   :  { %v1093_v51 = vsub.s32 5, %v2035_v13 }
 0x459   :  { %v1005_v12 = vadd.f32 %v1004_v8, %v2197_v55  ;;  %v1017_v16 = vadd.f32 %v1016_v58, %v1014_v9 }
 0x45b   :  { %v1006_v18 = vrot.slane %v1005_v12, 4  ;;  %v1018_v19 = vadd.f32 %v1017_v16, %v1015_v11 }
 0x45d   :  { %v1007_v22 = vadd.f32 %v1006_v18, %v1005_v12  ;;  %v1019_v23 = vrot.slane %v1018_v19, 4  ;;  %v1094_v12 = vrot.slane %v1780_v5, %v1093_v51 }
 0x45f   :  { %v1008_v25 = vrot.slane %v1007_v22, 2  ;;  %v1020_v26 = vadd.f32 %v1019_v23, %v1018_v19 }
 0x461   :  { %v1009_v28 = vadd.f32 %v1008_v25, %v1007_v22  ;;  %v1021_v29 = vrot.slane %v1020_v26, 2 }
 0x463   :  { %v1010_v31 = vrot.slane %v1009_v28, 1  ;;  %v1022_v32 = vadd.f32 %v1021_v29, %v1020_v26 }
 0x465   :  { %v1023_v34 = vrot.slane %v1022_v32, 1  ;;  %v1011_v36 = vadd.f32 %v1010_v31, %v1009_v28 }
 0x467   :  { %v1024_v38 = vadd.f32 %v1023_v34, %v1022_v32 }
 0x469   :  { %v1047_v44 = vsel %vm445_vm0, %v1011_v36, %v1024_v38 }
 0x46a   :  { %v1048_v46 = vsel %vm613_vm1, %v1047_v44, %v1033_v39 }
 0x46b   :  { %v1050_v49 = vsel %vm1049_vm10, %v1048_v46, %v1046_v37 }
 0x46c   :  { %1051 = vrot.lane.b32.xlu0 %v1050_v49, %s1878_s6 }
 0x4de   :  { %v1052_v15 = vpop.permute.xlu0 %1051 }
 0x4df   :  { %v1053_v52 = vadd.f32 %v1052_v15, %v1050_v49 }
 0x4e1   :  { %1054 = vrot.lane.b32.xlu1 %v1053_v52, %s1880_s0 }
 0x553   :  { %v1055_v56 = vpop.permute.xlu1 %1054 }
 0x554   :  { %v1056_v41 = vadd.f32 %v1055_v56, %v1053_v52 }
 0x556   :  { %1057 = vrot.lane.b32.xlu0 %v1056_v41, %s1881_s20 }
 0x5c8   :  { %v1058_v43 = vpop.permute.xlu0 %1057 }
 0x5c9   :  { %v1059_v59 = vadd.f32 %v1058_v43, %v1056_v41 }
 0x5cb   :  { %1060 = vrot.lane.b32.xlu1 %v1059_v59, %s1882_s22 }
 0x63d   :  { %v1061_v60 = vpop.permute.xlu1 %1060 }
 0x63e   :  { %v1062_v63 = vadd.f32 %v1061_v60, %v1059_v59 }
 0x640   :  { %v1063_v0 = vmul.f32 0.001953125, %v1062_v63 }
 0x642   :  { %v1064_v47 = vmul.f32 %v1063_v0, %v1063_v0  ;;  %v1072_v62 = vrot.slane %v1063_v0, %v2038_v14  ;;  %v1102_v58 = vrot.slane %v1063_v0, %v486_v50 }
 0x644   :  { %v1066_v1 = vrot.slane %v1064_v47, 7  ;;  %v1073_v10 = vsub.f32 %v2193_v4, %v1072_v62  ;;  %v1074_v11 = vsub.f32 %v2191_v2, %v1072_v62  ;;  %v1075_v16 = vsub.f32 %v2203_v61, %v1072_v62  ;;  %v1176_v2 = vld [vmem:[%s2258_s4 + $0x8] ss:$0 sm:$0xff]  ;;  %s1883_s4 = smov [#allocation8]  }
 0x645   :  { %v1076_v17 = vsub.f32 %v2197_v55, %v1072_v62  ;;  %v1103_v19 = vsub.f32 %v2171_v42, %v1102_v58  ;;  %v1104_v50 = vsub.f32 %v2168_v40, %v1102_v58  ;;  %v1105_v21 = vsub.f32 %v2178_v54, %v1102_v58  ;;  %s1151_s27 = sshll.u32 %s1883_s4, 4  ;;  %s1152_s27 = int_to_ptr.vmem [resolvable:$true] %s1151_s27 }
 0x646   :  { %v1068_v3 = vsub.f32 %v1063_v0, %v1066_v1  ;;  %v1106_v4 = vsub.f32 %v2183_v57, %v1102_v58  ;;  %s1847_s28 = scalar_lea.vmem %s1152_s27, 512  ;;  %p1852_p11 = scmp.lt.s32.totalorder %s1152_s27, %s1152_s27 }
 0x647   :  { %p1848_p10 = scmp.ne.s32.totalorder %s1152_s27, %s1847_s28  ;;  %p1853_p12 = scmp.lt.s32.totalorder %s1847_s28, %s1847_s28 }
 0x648   :  { %v1077_v45 = vadd.f32 1e-05, %v1068_v3 }
 0x649   :  { %p1854_p13 = por %p1853_p12, %p1852_p11 }
 0x64a   :  { %1778 = vrsqrt.f32 %v1077_v45 }
 0x64b   :  { %p1855_p0 = pnand %p1854_p13, %p1848_p10 }
 0x654   :  { %v1779_v7 = vpop.eup %1778 }
 0x655   :  { %v1082_v8 = vmul.f32 %v1779_v7, %v1080_v48  ;;  %v1109_v9 = vmul.f32 %v1779_v7, %v1107_v6 }
 0x657   :  { %v1086_v14 = vrot.slane %v1082_v8, %v478_v20  ;;  %v1113_v18 = vrot.slane %v1109_v9, %v746_v53 }
 0x659   :  { %v1087_v61 = vmul.f32 %v1086_v14, %v1073_v10  ;;  %v1088_v55 = vmul.f32 %v1086_v14, %v1074_v11  ;;  %v1089_v22 = vmul.f32 %v1086_v14, %v1075_v16  ;;  %v1090_v23 = vmul.f32 %v1086_v14, %v1076_v17 }
 0x65a   :  { %v1114_v20 = vmul.f32 %v1113_v18, %v1103_v19  ;;  %v1115_v24 = vmul.f32 %v1113_v18, %v1104_v50  ;;  %v1116_v13 = vmul.f32 %v1113_v18, %v1105_v21  ;;  %v1117_v53 = vmul.f32 %v1113_v18, %v1106_v4 }
 0x65b   :  { %v1095_v25 = vadd.f32 %v1094_v12, %v1087_v61  ;;  %v1096_v42 = vadd.f32 %v1094_v12, %v1088_v55  ;;  %v1097_v26 = vadd.f32 %v1094_v12, %v1089_v22  ;;  %v1098_v40 = vadd.f32 %v1094_v12, %v1090_v23 }
 0x65c   :  { %v1122_v27 = vadd.f32 %v1176_v2, %v1114_v20  ;;  %v1123_v54 = vadd.f32 %v1176_v2, %v1115_v24  ;;  %v1124_v28 = vadd.f32 %v1176_v2, %v1116_v13  ;;  %v1125_v57 = vadd.f32 %v1176_v2, %v1117_v53 }
 0x65e   :  { %v1126_v29 = vadd.f32 %v1122_v27, %v1095_v25  ;;  %v1127_v30 = vadd.f32 %v1123_v54, %v1096_v42  ;;  %v1128_v31 = vadd.f32 %v1124_v28, %v1097_v26  ;;  %v1129_v32 = vadd.f32 %v1125_v57, %v1098_v40 }
 0x660   :  { %vm1130_vm11 = vcmp.gt.f32.partialorder %v1126_v29, 0.0  ;;  %vm1131_vm12 = vcmp.gt.f32.partialorder %v1127_v30, 0.0  ;;  %vm1132_vm13 = vcmp.gt.f32.partialorder %v1128_v31, 0.0  ;;  %vm1133_vm14 = vcmp.gt.f32.partialorder %v1129_v32, 0.0 }
 0x661   :  { %v1134_v33 = vmul.f32 0.2, %v1126_v29  ;;  %v1135_v34 = vmul.f32 0.2, %v1127_v30  ;;  %v1136_v35 = vmul.f32 0.2, %v1128_v31 }
 0x662   :  { %v1137_v36 = vmul.f32 0.2, %v1129_v32 }
 0x663   :  { %v1138_v38 = vsel %vm1130_vm11, %v1126_v29, %v1134_v33  ;;  %v1139_v39 = vsel %vm1131_vm12, %v1127_v30, %v1135_v34  ;;  %v1140_v37 = vsel %vm1132_vm13, %v1128_v31, %v1136_v35 }
 0x664   :  { %v1141_v44 = vsel %vm1133_vm14, %v1129_v32, %v1137_v36  ;;  %1142 = vst [vmem:[#allocation8] sm:$0xff] %v1138_v38  ;;  %1143 = vst [vmem:[#allocation8 + $0x8] sm:$0xff] %v1139_v39 }
 0x665   :  { %1144 = vst [vmem:[#allocation8 + $0x10] sm:$0xff] %v1140_v37  ;;  %1145 = vst [vmem:[#allocation8 + $0x18] sm:$0xff] %v1141_v44 }
 0x666   :  { %1858 = shalt.err (!%p1855_p0)
}
 0x667   :  { %s1859_s3 = scalar_lea.hbm %s2259_s5, 512 }
 0x668   :  { %p1860_p1 = scmp.ne.s32.totalorder %s2259_s5, %s1859_s3  ;;  %p1863_p2 = scmp.lt.u32.totalorder %s1859_s3, %s2259_s5 }
 0x66a   :  { %p1865_p3 = pnand %p1863_p2, %p1860_p1 }
 0x66c   :  { %1868 = shalt.err (!%p1865_p3)
}
 0x66d   :  { %1157 = dma.vmem_to_hbm [thread:$0]  %s1152_s27, 512, %s2259_s5, [#allocation4], %s1877_s30, %s1877_s30, %s1878_s6  }
 0x66e   :  { %1873 = dma.done.wait [#allocation4], 512  }
 0x66f   :  { %1874 = vsyncadd [#allocation4], 4294966784 }
 0x670   :  { %1161 = vsyncpa [#allocation3], 1 }
 0x671   :  { %1162 = vsyncpa [#allocation6], 1 }
 0x672   :  { %1163 = vsyncpa [#allocation4], 1 }

</bundles_post_ra>
